<compile_context>
chip_gen: v6e
topology: v6e:2x2x1
jax: 0.10.0
libtpu: 0.0.40
codegen_flags: <defaults>
</compile_context>

<pallas_src>
import numpy as np
import jax
import jax.numpy as jnp
from jax.experimental import pallas as pl
from jax.experimental.pallas import tpu as pltpu

# ----------------------------- model dims (tiny) -----------------------------
V      = 128          # vocab size
DM     = 32           # d_model
H      = 2            # num heads
DK     = 16           # d_kv per head
INNER  = H * DK       # 32
DFF    = 64           # feed-forward inner dim
NB     = 32           # relative-attention num buckets
PAD    = 0            # pad / decoder-start token id (mT5 convention)
NEG    = -1e9         # additive mask value
GELU_C = float(np.sqrt(2.0 / np.pi))

# ========================= in-kernel helper functions ========================

def _rms(x, w):
    """T5 LayerNorm: no mean subtraction, no bias.  x:(rows,DM), w:(1,DM)."""
    var = jnp.mean(x * x, axis=-1, keepdims=True)
    return x * jax.lax.rsqrt(var + 1e-6) * w


def _softmax_rows(s):
    s = s - jnp.max(s, axis=-1, keepdims=True)
    p = jnp.exp(s)
    return p * pl.reciprocal(jnp.sum(p, axis=-1, keepdims=True), approx=True)


def _mha(q, k, v, bias_per_head):
    """All-heads T5 attention (no 1/sqrt(dk) scaling), static unroll over H.

    q:(Sq, INNER), k/v:(Sk, INNER); bias_per_head(h) -> additive (Sq,Sk) bias
    (or (1,Sk), broadcast).  Returns (Sq, INNER), heads concatenated on lanes.
    """
    outs = []
    for hh in range(H):
        qh = q[:, hh * DK:(hh + 1) * DK]
        kh = k[:, hh * DK:(hh + 1) * DK]
        vh = v[:, hh * DK:(hh + 1) * DK]
        s = jnp.dot(qh, kh.T, preferred_element_type=jnp.float32) + bias_per_head(hh)
        p = _softmax_rows(s)
        outs.append(jnp.dot(p, vh, preferred_element_type=jnp.float32))
    return jnp.concatenate(outs, axis=-1)


def _gated_gelu_ffn(n, wi, wo):
    """mT5 gated-GELU FF with wi0/wi1 packed into one (DM, 2*DFF) weight."""
    hg = jnp.dot(n, wi, preferred_element_type=jnp.float32)      # (rows, 2*DFF)
    h0 = hg[:, 0:DFF]
    h1 = hg[:, DFF:2 * DFF]
    g = 0.5 * h0 * (1.0 + jnp.tanh(GELU_C * (h0 + 0.044715 * (h0 * h0 * h0))))
    return jnp.dot(g * h1, wo, preferred_element_type=jnp.float32)


# ================================ Pallas kernel ==============================

def _t5_fused_kernel(
        # activations / masks / biases / labels (per-batch blocks)
        x_ref, y_ref, smask_ref, ebias_ref, dbias_ref, labels_ref,
        # encoder weights
        eln1_ref, eqkv_ref, eo_ref, eln2_ref, ewi_ref, ewo_ref, elnf_ref,
        # decoder weights
        dln1_ref, dsqkv_ref, dso_ref, dln2_ref, dcq_ref, dckv_ref, dco_ref,
        dln3_ref, dwi_ref, dwo_ref, dlnf_ref,
        # lm head
        lmw_ref,
        # outputs
        logits_ref, pred_ref, total_ref, count_ref):
    """Whole mT5 forward (1 enc layer + 1 dec layer + lm head + CE + argmax)
    for one batch element -- everything stays in VMEM."""
    x = x_ref[0].astype(jnp.float32)                      # (S, DM)
    y = y_ref[0].astype(jnp.float32)                      # (T, DM)
    add_mask = (1.0 - smask_ref[0]) * NEG                 # (1, S) key-padding mask

    # ------------------------------ encoder ----------------------------------
    n = _rms(x, eln1_ref[...])
    qkv = jnp.dot(n, eqkv_ref[...], preferred_element_type=jnp.float32)  # (S, 3*INNER)
    q = qkv[:, 0:INNER]
    k = qkv[:, INNER:2 * INNER]
    v = qkv[:, 2 * INNER:3 * INNER]
    attn = _mha(q, k, v, lambda hh: ebias_ref[hh] + add_mask)
    h = x + jnp.dot(attn, eo_ref[...], preferred_element_type=jnp.float32)

    n = _rms(h, eln2_ref[...])
    h = h + _gated_gelu_ffn(n, ewi_ref[...], ewo_ref[...])

    enc = _rms(h, elnf_ref[...])                          # (S, DM) final enc LN

    # ------------------------------ decoder ----------------------------------
    # causal self attention (causal + rel-pos bias baked into dbias)
    n = _rms(y, dln1_ref[...])
    qkv = jnp.dot(n, dsqkv_ref[...], preferred_element_type=jnp.float32)  # (T, 3*INNER)
    q = qkv[:, 0:INNER]
    k = qkv[:, INNER:2 * INNER]
    v = qkv[:, 2 * INNER:3 * INNER]
    attn = _mha(q, k, v, lambda hh: dbias_ref[hh])
    h = y + jnp.dot(attn, dso_ref[...], preferred_element_type=jnp.float32)

    # cross attention (no position bias, encoder padding mask only)
    n = _rms(h, dln2_ref[...])
    q = jnp.dot(n, dcq_ref[...], preferred_element_type=jnp.float32)      # (T, INNER)
    kv = jnp.dot(enc, dckv_ref[...], preferred_element_type=jnp.float32)  # (S, 2*INNER)
    k = kv[:, 0:INNER]
    v = kv[:, INNER:2 * INNER]
    attn = _mha(q, k, v, lambda hh: add_mask)
    h = h + jnp.dot(attn, dco_ref[...], preferred_element_type=jnp.float32)

    # gated-GELU FFN
    n = _rms(h, dln3_ref[...])
    h = h + _gated_gelu_ffn(n, dwi_ref[...], dwo_ref[...])

    dec = _rms(h, dlnf_ref[...])                          # (T, DM) final dec LN

    # ----------------- lm head + CE partial sums + argmax --------------------
    logits = jnp.dot(dec, lmw_ref[...], preferred_element_type=jnp.float32)  # (T, V)
    logits_ref[0] = logits

    labels = labels_ref[0]                                 # (T, 1) int32
    m = jnp.max(logits, axis=-1, keepdims=True)
    e = jnp.exp(logits - m)
    lse = m + jnp.log(jnp.sum(e, axis=-1, keepdims=True))
    iota = jax.lax.broadcasted_iota(jnp.int32, logits.shape, 1)
    onehot = (iota == labels).astype(jnp.float32)
    label_logit = jnp.sum(logits * onehot, axis=-1, keepdims=True)
    valid = (labels != -100).astype(jnp.float32)
    total_ref[0] = jnp.sum((lse - label_logit) * valid, axis=0, keepdims=True)  # (1,1)
    count_ref[0] = jnp.sum(valid, axis=0, keepdims=True)                        # (1,1)

    cand = jnp.where(logits == m, iota, logits.shape[-1])  # first max index
    pred_ref[0] = jnp.min(cand, axis=-1, keepdims=True)    # (T,1)


# ================================ wrapper ====================================

def t5_fused_forward(params, x_emb, y_emb, src_mask, enc_bias, dec_bias, labels_3d):
    """x_emb:(B,S,DM), y_emb:(B,T,DM), src_mask:(B,1,S) f32 {0,1},
    enc_bias:(H,S,S), dec_bias:(H,T,T), labels_3d:(B,T,1) int32 (-100 ignore)."""
    B, S, _ = x_emb.shape
    T = y_emb.shape[1]
    pe = params['enc0']
    pd = params['dec0']

    full2d = lambda shape: pl.BlockSpec(shape, lambda b: (0, 0))

    logits, pred, total, count = pl.pallas_call(
        _t5_fused_kernel,
        out_shape=(jax.ShapeDtypeStruct((B, T, V), jnp.float32),
                   jax.ShapeDtypeStruct((B, T, 1), jnp.int32),
                   jax.ShapeDtypeStruct((B, 1, 1), jnp.float32),
                   jax.ShapeDtypeStruct((B, 1, 1), jnp.float32)),
        grid=(B,),
        in_specs=[
            pl.BlockSpec((1, S, DM), lambda b: (b, 0, 0)),      # x embeddings
            pl.BlockSpec((1, T, DM), lambda b: (b, 0, 0)),      # y embeddings
            pl.BlockSpec((1, 1, S),  lambda b: (b, 0, 0)),      # padding mask
            pl.BlockSpec((H, S, S),  lambda b: (0, 0, 0)),      # enc rel-pos bias
            pl.BlockSpec((H, T, T),  lambda b: (0, 0, 0)),      # dec causal+relpos
            pl.BlockSpec((1, T, 1),  lambda b: (b, 0, 0)),      # labels
            # encoder weights
            full2d((1, DM)),                                    # enc ln1
            full2d((DM, 3 * INNER)),                            # enc packed QKV
            full2d((INNER, DM)),                                # enc O proj
            full2d((1, DM)),                                    # enc ln2
            full2d((DM, 2 * DFF)),                              # enc packed wi0|wi1
            full2d((DFF, DM)),                                  # enc FFN out proj
            full2d((1, DM)),                                    # enc final LN
            # decoder weights
            full2d((1, DM)),                                    # dec ln1
            full2d((DM, 3 * INNER)),                            # dec self packed QKV
            full2d((INNER, DM)),                                # dec self O proj
            full2d((1, DM)),                                    # dec ln2
            full2d((DM, INNER)),                                # cross Q
            full2d((DM, 2 * INNER)),                            # cross packed KV
            full2d((INNER, DM)),                                # cross O proj
            full2d((1, DM)),                                    # dec ln3
            full2d((DM, 2 * DFF)),                              # dec packed wi0|wi1
            full2d((DFF, DM)),                                  # dec FFN out proj
            full2d((1, DM)),                                    # dec final LN
            # lm head
            full2d((DM, V)),
        ],
        out_specs=(pl.BlockSpec((1, T, V), lambda b: (b, 0, 0)),
                   pl.BlockSpec((1, T, 1), lambda b: (b, 0, 0)),
                   pl.BlockSpec((1, 1, 1), lambda b: (b, 0, 0)),
                   pl.BlockSpec((1, 1, 1), lambda b: (b, 0, 0))),
        compiler_params=pltpu.CompilerParams(dimension_semantics=("parallel",)),
    )(x_emb, y_emb, src_mask, enc_bias, dec_bias, labels_3d,
      pe['ln1'], pe['qkv'], pe['o'], pe['ln2'], pe['wi'], pe['wo'],
      params['enc_final_ln'],
      pd['ln1'], pd['sqkv'], pd['so'], pd['ln2'], pd['cq'], pd['ckv'], pd['co'],
      pd['ln3'], pd['wi'], pd['wo'], params['dec_final_ln'],
      params['lm_head'])

    # cross-batch CE mean: two scalar reductions on (B,1,1) arrays.
    loss = jnp.sum(total) / jnp.maximum(jnp.sum(count), 1.0)
    return logits, pred[:, :, 0], loss


# ============================ glue (plain JAX) ================================

def _relative_position_bucket(relative_position, bidirectional, num_buckets=NB,
                              max_distance=128):
    relative_buckets = jnp.zeros_like(relative_position)
    if bidirectional:
        num_buckets //= 2
        relative_buckets += (relative_position > 0).astype(jnp.int32) * num_buckets
        relative_position = jnp.abs(relative_position)
    else:
        relative_position = -jnp.minimum(relative_position, 0)
    max_exact = num_buckets // 2
    is_small = relative_position < max_exact
    rp_safe = jnp.maximum(relative_position, 1).astype(jnp.float32)
    rp_if_large = max_exact + (
        jnp.log(rp_safe / max_exact) / np.log(max_distance / max_exact)
        * (num_buckets - max_exact)
    ).astype(jnp.int32)
    rp_if_large = jnp.minimum(rp_if_large, num_buckets - 1)
    return relative_buckets + jnp.where(is_small, relative_position, rp_if_large)


def compute_pos_bias(q_len, k_len, bidirectional, rel_emb):
    ctx = jnp.arange(q_len, dtype=jnp.int32)[:, None]
    mem = jnp.arange(k_len, dtype=jnp.int32)[None, :]
    rel = mem - ctx
    buckets = _relative_position_bucket(rel, bidirectional)
    vals = rel_emb[buckets]                         # (q, k, H)  -- glue gather
    return jnp.transpose(vals, (2, 0, 1))           # (H, q, k)


def init_params(key):
    ks = iter(jax.random.split(key, 40))

    def w(shape, scale=0.02):
        return (scale * jax.random.normal(next(ks), shape)).astype(jnp.float32)

    ones_ln = lambda: jnp.ones((1, DM), jnp.float32)
    return {
        'shared': w((V, DM)),
        'lm_head': w((DM, V)),         # mT5: untied lm_head, no d_model**-0.5 rescale
        'enc_rel_bias': w((NB, H)),
        'dec_rel_bias': w((NB, H)),
        'enc_final_ln': ones_ln(),
        'dec_final_ln': ones_ln(),
        'enc0': {
            'ln1': ones_ln(), 'ln2': ones_ln(),
            'qkv': w((DM, 3 * INNER)),       # packed Q|K|V
            'o': w((INNER, DM)),
            'wi': w((DM, 2 * DFF)),          # packed wi0|wi1 (lane-dense 128)
            'wo': w((DFF, DM)),
        },
        'dec0': {
            'ln1': ones_ln(), 'ln2': ones_ln(), 'ln3': ones_ln(),
            'sqkv': w((DM, 3 * INNER)),      # packed self Q|K|V
            'so': w((INNER, DM)),
            'cq': w((DM, INNER)),
            'ckv': w((DM, 2 * INNER)),       # packed cross K|V
            'co': w((INNER, DM)),
            'wi': w((DM, 2 * DFF)),
            'wo': w((DFF, DM)),
        },
    }


def mt5_forward(params, source_ids, source_mask, labels):
    """Equivalent of: outputs = self.model(input_ids, attention_mask, labels=...)
       followed by predicted_ids = logits.argmax(-1)."""
    B, S = source_ids.shape
    T = labels.shape[1]
    emb = params['shared']

    # embeddings + masks + biases (gathers / trivially small glue in plain JAX)
    x = jnp.take(emb, source_ids, axis=0)                        # (B,S,DM)
    src_mask_f = source_mask.astype(jnp.float32).reshape(B, 1, S)
    enc_pos_bias = compute_pos_bias(S, S, True, params['enc_rel_bias'])   # (H,S,S)

    dec_in = jnp.concatenate(
        [jnp.full((B, 1), PAD, jnp.int32), labels[:, :-1]], axis=1)       # shift-right
    dec_in = jnp.where(dec_in == -100, PAD, dec_in)
    y = jnp.take(emb, dec_in, axis=0)                            # (B,T,DM)

    causal_add = jnp.where(
        jnp.arange(T)[None, :] <= jnp.arange(T)[:, None], 0.0, NEG)       # (T,T)
    dec_self_bias = (compute_pos_bias(T, T, False, params['dec_rel_bias'])
                     + causal_add[None])                                  # (H,T,T)

    labels_3d = labels.reshape(B, T, 1).astype(jnp.int32)

    # ------------------ single fused pallas_call over the batch --------------
    logits, pred, loss = t5_fused_forward(
        params, x, y, src_mask_f, enc_pos_bias, dec_self_bias, labels_3d)

    return {'decode_result': pred, 'loss': loss, 'logits': logits}


# TODO(synk): tokenizer batch_encode_plus / batch_decode (string processing) and
# pretrained-checkpoint loading have no Pallas equivalent; synthetic ids/weights
# are used instead.  model.generate (autoregressive decoding) in model_test is
# likewise out of scope for a single forward kernel.
# TODO(synk): at real mT5 dims, the lm_head / FFN matmuls must be tiled
# (K-loop + f32 accumulator, bf16 MXU operands) instead of single VMEM blocks.

if __name__ == "__main__":
    key = jax.random.PRNGKey(0)
    k_param, k_src, k_tgt = jax.random.split(key, 3)

    B, S, T = 2, 8, 8
    params = init_params(k_param)

    source_ids = jax.random.randint(k_src, (B, S), 2, V, dtype=jnp.int32)
    source_ids = source_ids.at[:, -2:].set(PAD)                    # simulate padding
    source_attention_mask = (source_ids != PAD).astype(jnp.int32)

    target_ids = jax.random.randint(k_tgt, (B, T), 2, V, dtype=jnp.int32)
    target_ids = target_ids.at[1, -3:].set(PAD)
    labels = jnp.where(target_ids == PAD, -100, target_ids).astype(jnp.int32)

    fwd = jax.jit(mt5_forward)
    out = fwd(params, source_ids, source_attention_mask, labels)
    jax.block_until_ready(out['loss'])
    jax.block_until_ready(out['decode_result'])

    assert out['decode_result'].shape == (B, T)
    assert out['logits'].shape == (B, T, V)
    assert bool(jnp.isfinite(out['loss']))
    print("KERNEL_OK")
</pallas_src>

<mosaic_0001>
module attributes {stable_mosaic.version = 11 : i64} {
  func.func @_t5_fused_kernel(%arg0: i32, %arg1: memref<1x8x32xf32, #tpu.memory_space<vmem>>, %arg2: memref<1x8x32xf32, #tpu.memory_space<vmem>>, %arg3: memref<1x1x8xf32, #tpu.memory_space<vmem>>, %arg4: memref<2x8x8xf32, #tpu.memory_space<vmem>>, %arg5: memref<2x8x8xf32, #tpu.memory_space<vmem>>, %arg6: memref<1x8x1xi32, #tpu.memory_space<vmem>>, %arg7: memref<1x32xf32, #tpu.memory_space<vmem>>, %arg8: memref<32x96xf32, #tpu.memory_space<vmem>>, %arg9: memref<32x32xf32, #tpu.memory_space<vmem>>, %arg10: memref<1x32xf32, #tpu.memory_space<vmem>>, %arg11: memref<32x128xf32, #tpu.memory_space<vmem>>, %arg12: memref<64x32xf32, #tpu.memory_space<vmem>>, %arg13: memref<1x32xf32, #tpu.memory_space<vmem>>, %arg14: memref<1x32xf32, #tpu.memory_space<vmem>>, %arg15: memref<32x96xf32, #tpu.memory_space<vmem>>, %arg16: memref<32x32xf32, #tpu.memory_space<vmem>>, %arg17: memref<1x32xf32, #tpu.memory_space<vmem>>, %arg18: memref<32x32xf32, #tpu.memory_space<vmem>>, %arg19: memref<32x64xf32, #tpu.memory_space<vmem>>, %arg20: memref<32x32xf32, #tpu.memory_space<vmem>>, %arg21: memref<1x32xf32, #tpu.memory_space<vmem>>, %arg22: memref<32x128xf32, #tpu.memory_space<vmem>>, %arg23: memref<64x32xf32, #tpu.memory_space<vmem>>, %arg24: memref<1x32xf32, #tpu.memory_space<vmem>>, %arg25: memref<32x128xf32, #tpu.memory_space<vmem>>, %arg26: memref<1x8x128xf32, #tpu.memory_space<vmem>>, %arg27: memref<1x8x1xi32, #tpu.memory_space<vmem>>, %arg28: memref<1x1x1xf32, #tpu.memory_space<vmem>>, %arg29: memref<1x1x1xf32, #tpu.memory_space<vmem>>) attributes {dimension_semantics = [#tpu.dimension_semantics<parallel>], iteration_bounds = array<i64: 2>, scalar_prefetch = 0 : i64, scratch_operands = 0 : i64, tpu.core_type = #tpu.core_type<tc>, window_params = [{transform_indices = @transform_0, window_bounds = array<i64: 1, 8, 32>}, {transform_indices = @transform_1, window_bounds = array<i64: 1, 8, 32>}, {transform_indices = @transform_2, window_bounds = array<i64: 1, 1, 8>}, {pipeline_mode = #tpu.pipeline_mode<synchronous>, transform_indices = @transform_3, window_bounds = array<i64: 2, 8, 8>}, {pipeline_mode = #tpu.pipeline_mode<synchronous>, transform_indices = @transform_4, window_bounds = array<i64: 2, 8, 8>}, {transform_indices = @transform_5, window_bounds = array<i64: 1, 8, 1>}, {pipeline_mode = #tpu.pipeline_mode<synchronous>, transform_indices = @transform_6, window_bounds = array<i64: 1, 32>}, {pipeline_mode = #tpu.pipeline_mode<synchronous>, transform_indices = @transform_7, window_bounds = array<i64: 32, 96>}, {pipeline_mode = #tpu.pipeline_mode<synchronous>, transform_indices = @transform_8, window_bounds = array<i64: 32, 32>}, {pipeline_mode = #tpu.pipeline_mode<synchronous>, transform_indices = @transform_9, window_bounds = array<i64: 1, 32>}, {pipeline_mode = #tpu.pipeline_mode<synchronous>, transform_indices = @transform_10, window_bounds = array<i64: 32, 128>}, {pipeline_mode = #tpu.pipeline_mode<synchronous>, transform_indices = @transform_11, window_bounds = array<i64: 64, 32>}, {pipeline_mode = #tpu.pipeline_mode<synchronous>, transform_indices = @transform_12, window_bounds = array<i64: 1, 32>}, {pipeline_mode = #tpu.pipeline_mode<synchronous>, transform_indices = @transform_13, window_bounds = array<i64: 1, 32>}, {pipeline_mode = #tpu.pipeline_mode<synchronous>, transform_indices = @transform_14, window_bounds = array<i64: 32, 96>}, {pipeline_mode = #tpu.pipeline_mode<synchronous>, transform_indices = @transform_15, window_bounds = array<i64: 32, 32>}, {pipeline_mode = #tpu.pipeline_mode<synchronous>, transform_indices = @transform_16, window_bounds = array<i64: 1, 32>}, {pipeline_mode = #tpu.pipeline_mode<synchronous>, transform_indices = @transform_17, window_bounds = array<i64: 32, 32>}, {pipeline_mode = #tpu.pipeline_mode<synchronous>, transform_indices = @transform_18, window_bounds = array<i64: 32, 64>}, {pipeline_mode = #tpu.pipeline_mode<synchronous>, transform_indices = @transform_19, window_bounds = array<i64: 32, 32>}, {pipeline_mode = #tpu.pipeline_mode<synchronous>, transform_indices = @transform_20, window_bounds = array<i64: 1, 32>}, {pipeline_mode = #tpu.pipeline_mode<synchronous>, transform_indices = @transform_21, window_bounds = array<i64: 32, 128>}, {pipeline_mode = #tpu.pipeline_mode<synchronous>, transform_indices = @transform_22, window_bounds = array<i64: 64, 32>}, {pipeline_mode = #tpu.pipeline_mode<synchronous>, transform_indices = @transform_23, window_bounds = array<i64: 1, 32>}, {pipeline_mode = #tpu.pipeline_mode<synchronous>, transform_indices = @transform_24, window_bounds = array<i64: 32, 128>}, {transform_indices = @transform_25, window_bounds = array<i64: 1, 8, 128>}, {transform_indices = @transform_26, window_bounds = array<i64: 1, 8, 1>}, {transform_indices = @transform_27, window_bounds = array<i64: 1, 1, 1>}, {transform_indices = @transform_28, window_bounds = array<i64: 1, 1, 1>}]} {
    %c0 = arith.constant 0 : index
    %c0_0 = arith.constant 0 : index
    %c0_1 = arith.constant 0 : index
    %0 = vector.load %arg1[%c0, %c0_0, %c0_1] : memref<1x8x32xf32, #tpu.memory_space<vmem>>, vector<1x8x32xf32>
    %1 = vector.shape_cast %0 : vector<1x8x32xf32> to vector<8x32xf32>
    %c0_2 = arith.constant 0 : index
    %c0_3 = arith.constant 0 : index
    %c0_4 = arith.constant 0 : index
    %2 = vector.load %arg2[%c0_2, %c0_3, %c0_4] : memref<1x8x32xf32, #tpu.memory_space<vmem>>, vector<1x8x32xf32>
    %3 = vector.shape_cast %2 : vector<1x8x32xf32> to vector<8x32xf32>
    %c0_5 = arith.constant 0 : index
    %c0_6 = arith.constant 0 : index
    %c0_7 = arith.constant 0 : index
    %4 = vector.load %arg3[%c0_5, %c0_6, %c0_7] : memref<1x1x8xf32, #tpu.memory_space<vmem>>, vector<1x1x8xf32>
    %5 = vector.shape_cast %4 : vector<1x1x8xf32> to vector<1x8xf32>
    %cst = arith.constant 1.000000e+00 : f32
    %6 = vector.broadcast %cst : f32 to vector<1x8xf32>
    %7 = arith.subf %6, %5 : vector<1x8xf32>
    %cst_8 = arith.constant -1.000000e+09 : f32
    %8 = vector.broadcast %cst_8 : f32 to vector<1x8xf32>
    %9 = arith.mulf %7, %8 : vector<1x8xf32>
    %c0_9 = arith.constant 0 : index
    %c0_10 = arith.constant 0 : index
    %10 = vector.load %arg7[%c0_9, %c0_10] : memref<1x32xf32, #tpu.memory_space<vmem>>, vector<1x32xf32>
    %11 = arith.mulf %1, %1 : vector<8x32xf32>
    %cst_11 = arith.constant dense<0.000000e+00> : vector<8xf32>
    %12 = vector.multi_reduction <add>, %11, %cst_11 [1] : vector<8x32xf32> to vector<8xf32>
    %13 = vector.shape_cast %12 : vector<8xf32> to vector<8x1xf32>
    %cst_12 = arith.constant 3.200000e+01 : f32
    %14 = vector.broadcast %cst_12 : f32 to vector<8x1xf32>
    %15 = arith.divf %13, %14 : vector<8x1xf32>
    %cst_13 = arith.constant 9.99999997E-7 : f32
    %16 = vector.broadcast %cst_13 : f32 to vector<8x1xf32>
    %17 = arith.addf %15, %16 : vector<8x1xf32>
    %18 = math.rsqrt %17 : vector<8x1xf32>
    %19 = vector.broadcast %18 : vector<8x1xf32> to vector<8x32xf32>
    %20 = arith.mulf %1, %19 : vector<8x32xf32>
    %21 = vector.broadcast %10 : vector<1x32xf32> to vector<8x32xf32>
    %22 = arith.mulf %20, %21 : vector<8x32xf32>
    %c0_14 = arith.constant 0 : index
    %c0_15 = arith.constant 0 : index
    %23 = vector.load %arg8[%c0_14, %c0_15] : memref<32x96xf32, #tpu.memory_space<vmem>>, vector<32x96xf32>
    %cst_16 = arith.constant dense<0.000000e+00> : vector<8x96xf32>
    %24 = tpu.matmul %22, %23, %cst_16 {dimension_numbers = #tpu.dot_dimension_numbers<[1], [0], [0], [1], [0, 0, 1, 1], [], []>} : vector<8x32xf32>, vector<32x96xf32>, vector<8x96xf32> -> vector<8x96xf32>
    %25 = vector.extract_strided_slice %24 {offsets = [0, 0], sizes = [8, 32], strides = [1, 1]} : vector<8x96xf32> to vector<8x32xf32>
    %26 = vector.extract_strided_slice %24 {offsets = [0, 32], sizes = [8, 32], strides = [1, 1]} : vector<8x96xf32> to vector<8x32xf32>
    %27 = vector.extract_strided_slice %24 {offsets = [0, 64], sizes = [8, 32], strides = [1, 1]} : vector<8x96xf32> to vector<8x32xf32>
    %28 = vector.extract_strided_slice %25 {offsets = [0, 0], sizes = [8, 16], strides = [1, 1]} : vector<8x32xf32> to vector<8x16xf32>
    %29 = vector.extract_strided_slice %26 {offsets = [0, 0], sizes = [8, 16], strides = [1, 1]} : vector<8x32xf32> to vector<8x16xf32>
    %30 = vector.extract_strided_slice %27 {offsets = [0, 0], sizes = [8, 16], strides = [1, 1]} : vector<8x32xf32> to vector<8x16xf32>
    %31 = tpu.transpose %29, [1, 0] : vector<8x16xf32> -> vector<16x8xf32>
    %cst_17 = arith.constant dense<0.000000e+00> : vector<8x8xf32>
    %32 = tpu.matmul %28, %31, %cst_17 {dimension_numbers = #tpu.dot_dimension_numbers<[1], [0], [0], [1], [0, 0, 1, 1], [], []>} : vector<8x16xf32>, vector<16x8xf32>, vector<8x8xf32> -> vector<8x8xf32>
    %c0_18 = arith.constant 0 : index
    %c0_19 = arith.constant 0 : index
    %c0_20 = arith.constant 0 : index
    %33 = vector.load %arg4[%c0_18, %c0_19, %c0_20] : memref<2x8x8xf32, #tpu.memory_space<vmem>>, vector<1x8x8xf32>
    %34 = vector.shape_cast %33 : vector<1x8x8xf32> to vector<8x8xf32>
    %35 = vector.broadcast %9 : vector<1x8xf32> to vector<8x8xf32>
    %36 = arith.addf %34, %35 : vector<8x8xf32>
    %37 = arith.addf %32, %36 : vector<8x8xf32>
    %cst_21 = arith.constant dense<0xFF800000> : vector<8xf32>
    %38 = vector.multi_reduction <maximumf>, %37, %cst_21 [1] : vector<8x8xf32> to vector<8xf32>
    %39 = vector.shape_cast %38 : vector<8xf32> to vector<8x1xf32>
    %40 = vector.broadcast %39 : vector<8x1xf32> to vector<8x8xf32>
    %41 = arith.subf %37, %40 : vector<8x8xf32>
    %42 = math.exp %41 : vector<8x8xf32>
    %cst_22 = arith.constant dense<0.000000e+00> : vector<8xf32>
    %43 = vector.multi_reduction <add>, %42, %cst_22 [1] : vector<8x8xf32> to vector<8xf32>
    %44 = vector.shape_cast %43 : vector<8xf32> to vector<8x1xf32>
    %45 = tpu.reciprocal %44 {approx = true} : vector<8x1xf32> -> vector<8x1xf32>
    %46 = vector.broadcast %45 : vector<8x1xf32> to vector<8x8xf32>
    %47 = arith.mulf %42, %46 : vector<8x8xf32>
    %cst_23 = arith.constant dense<0.000000e+00> : vector<8x16xf32>
    %48 = tpu.matmul %47, %30, %cst_23 {dimension_numbers = #tpu.dot_dimension_numbers<[1], [0], [0], [1], [0, 0, 1, 1], [], []>} : vector<8x8xf32>, vector<8x16xf32>, vector<8x16xf32> -> vector<8x16xf32>
    %49 = vector.extract_strided_slice %25 {offsets = [0, 16], sizes = [8, 16], strides = [1, 1]} : vector<8x32xf32> to vector<8x16xf32>
    %50 = vector.extract_strided_slice %26 {offsets = [0, 16], sizes = [8, 16], strides = [1, 1]} : vector<8x32xf32> to vector<8x16xf32>
    %51 = vector.extract_strided_slice %27 {offsets = [0, 16], sizes = [8, 16], strides = [1, 1]} : vector<8x32xf32> to vector<8x16xf32>
    %52 = tpu.transpose %50, [1, 0] : vector<8x16xf32> -> vector<16x8xf32>
    %cst_24 = arith.constant dense<0.000000e+00> : vector<8x8xf32>
    %53 = tpu.matmul %49, %52, %cst_24 {dimension_numbers = #tpu.dot_dimension_numbers<[1], [0], [0], [1], [0, 0, 1, 1], [], []>} : vector<8x16xf32>, vector<16x8xf32>, vector<8x8xf32> -> vector<8x8xf32>
    %c1 = arith.constant 1 : index
    %c0_25 = arith.constant 0 : index
    %c0_26 = arith.constant 0 : index
    %54 = vector.load %arg4[%c1, %c0_25, %c0_26] : memref<2x8x8xf32, #tpu.memory_space<vmem>>, vector<1x8x8xf32>
    %55 = vector.shape_cast %54 : vector<1x8x8xf32> to vector<8x8xf32>
    %56 = vector.broadcast %9 : vector<1x8xf32> to vector<8x8xf32>
    %57 = arith.addf %55, %56 : vector<8x8xf32>
    %58 = arith.addf %53, %57 : vector<8x8xf32>
    %cst_27 = arith.constant dense<0xFF800000> : vector<8xf32>
    %59 = vector.multi_reduction <maximumf>, %58, %cst_27 [1] : vector<8x8xf32> to vector<8xf32>
    %60 = vector.shape_cast %59 : vector<8xf32> to vector<8x1xf32>
    %61 = vector.broadcast %60 : vector<8x1xf32> to vector<8x8xf32>
    %62 = arith.subf %58, %61 : vector<8x8xf32>
    %63 = math.exp %62 : vector<8x8xf32>
    %cst_28 = arith.constant dense<0.000000e+00> : vector<8xf32>
    %64 = vector.multi_reduction <add>, %63, %cst_28 [1] : vector<8x8xf32> to vector<8xf32>
    %65 = vector.shape_cast %64 : vector<8xf32> to vector<8x1xf32>
    %66 = tpu.reciprocal %65 {approx = true} : vector<8x1xf32> -> vector<8x1xf32>
    %67 = vector.broadcast %66 : vector<8x1xf32> to vector<8x8xf32>
    %68 = arith.mulf %63, %67 : vector<8x8xf32>
    %cst_29 = arith.constant dense<0.000000e+00> : vector<8x16xf32>
    %69 = tpu.matmul %68, %51, %cst_29 {dimension_numbers = #tpu.dot_dimension_numbers<[1], [0], [0], [1], [0, 0, 1, 1], [], []>} : vector<8x8xf32>, vector<8x16xf32>, vector<8x16xf32> -> vector<8x16xf32>
    %70 = tpu.concatenate %48, %69 in 1 : vector<8x16xf32>, vector<8x16xf32> -> vector<8x32xf32>
    %c0_30 = arith.constant 0 : index
    %c0_31 = arith.constant 0 : index
    %71 = vector.load %arg9[%c0_30, %c0_31] : memref<32x32xf32, #tpu.memory_space<vmem>>, vector<32x32xf32>
    %cst_32 = arith.constant dense<0.000000e+00> : vector<8x32xf32>
    %72 = tpu.matmul %70, %71, %cst_32 {dimension_numbers = #tpu.dot_dimension_numbers<[1], [0], [0], [1], [0, 0, 1, 1], [], []>} : vector<8x32xf32>, vector<32x32xf32>, vector<8x32xf32> -> vector<8x32xf32>
    %73 = arith.addf %1, %72 : vector<8x32xf32>
    %c0_33 = arith.constant 0 : index
    %c0_34 = arith.constant 0 : index
    %74 = vector.load %arg10[%c0_33, %c0_34] : memref<1x32xf32, #tpu.memory_space<vmem>>, vector<1x32xf32>
    %75 = arith.mulf %73, %73 : vector<8x32xf32>
    %cst_35 = arith.constant dense<0.000000e+00> : vector<8xf32>
    %76 = vector.multi_reduction <add>, %75, %cst_35 [1] : vector<8x32xf32> to vector<8xf32>
    %77 = vector.shape_cast %76 : vector<8xf32> to vector<8x1xf32>
    %cst_36 = arith.constant 3.200000e+01 : f32
    %78 = vector.broadcast %cst_36 : f32 to vector<8x1xf32>
    %79 = arith.divf %77, %78 : vector<8x1xf32>
    %cst_37 = arith.constant 9.99999997E-7 : f32
    %80 = vector.broadcast %cst_37 : f32 to vector<8x1xf32>
    %81 = arith.addf %79, %80 : vector<8x1xf32>
    %82 = math.rsqrt %81 : vector<8x1xf32>
    %83 = vector.broadcast %82 : vector<8x1xf32> to vector<8x32xf32>
    %84 = arith.mulf %73, %83 : vector<8x32xf32>
    %85 = vector.broadcast %74 : vector<1x32xf32> to vector<8x32xf32>
    %86 = arith.mulf %84, %85 : vector<8x32xf32>
    %c0_38 = arith.constant 0 : index
    %c0_39 = arith.constant 0 : index
    %87 = vector.load %arg11[%c0_38, %c0_39] : memref<32x128xf32, #tpu.memory_space<vmem>>, vector<32x128xf32>
    %c0_40 = arith.constant 0 : index
    %c0_41 = arith.constant 0 : index
    %88 = vector.load %arg12[%c0_40, %c0_41] : memref<64x32xf32, #tpu.memory_space<vmem>>, vector<64x32xf32>
    %cst_42 = arith.constant dense<0.000000e+00> : vector<8x128xf32>
    %89 = tpu.matmul %86, %87, %cst_42 {dimension_numbers = #tpu.dot_dimension_numbers<[1], [0], [0], [1], [0, 0, 1, 1], [], []>} : vector<8x32xf32>, vector<32x128xf32>, vector<8x128xf32> -> vector<8x128xf32>
    %90 = vector.extract_strided_slice %89 {offsets = [0, 0], sizes = [8, 64], strides = [1, 1]} : vector<8x128xf32> to vector<8x64xf32>
    %91 = vector.extract_strided_slice %89 {offsets = [0, 64], sizes = [8, 64], strides = [1, 1]} : vector<8x128xf32> to vector<8x64xf32>
    %cst_43 = arith.constant 5.000000e-01 : f32
    %92 = vector.broadcast %cst_43 : f32 to vector<8x64xf32>
    %93 = arith.mulf %92, %90 : vector<8x64xf32>
    %94 = arith.mulf %90, %90 : vector<8x64xf32>
    %95 = arith.mulf %94, %90 : vector<8x64xf32>
    %cst_44 = arith.constant 4.471500e-02 : f32
    %96 = vector.broadcast %cst_44 : f32 to vector<8x64xf32>
    %97 = arith.mulf %96, %95 : vector<8x64xf32>
    %98 = arith.addf %90, %97 : vector<8x64xf32>
    %cst_45 = arith.constant 0.797884583 : f32
    %99 = vector.broadcast %cst_45 : f32 to vector<8x64xf32>
    %100 = arith.mulf %99, %98 : vector<8x64xf32>
    %101 = math.tanh %100 : vector<8x64xf32>
    %cst_46 = arith.constant 1.000000e+00 : f32
    %102 = vector.broadcast %cst_46 : f32 to vector<8x64xf32>
    %103 = arith.addf %102, %101 : vector<8x64xf32>
    %104 = arith.mulf %93, %103 : vector<8x64xf32>
    %105 = arith.mulf %104, %91 : vector<8x64xf32>
    %cst_47 = arith.constant dense<0.000000e+00> : vector<8x32xf32>
    %106 = tpu.matmul %105, %88, %cst_47 {dimension_numbers = #tpu.dot_dimension_numbers<[1], [0], [0], [1], [0, 0, 1, 1], [], []>} : vector<8x64xf32>, vector<64x32xf32>, vector<8x32xf32> -> vector<8x32xf32>
    %107 = arith.addf %73, %106 : vector<8x32xf32>
    %c0_48 = arith.constant 0 : index
    %c0_49 = arith.constant 0 : index
    %108 = vector.load %arg13[%c0_48, %c0_49] : memref<1x32xf32, #tpu.memory_space<vmem>>, vector<1x32xf32>
    %109 = arith.mulf %107, %107 : vector<8x32xf32>
    %cst_50 = arith.constant dense<0.000000e+00> : vector<8xf32>
    %110 = vector.multi_reduction <add>, %109, %cst_50 [1] : vector<8x32xf32> to vector<8xf32>
    %111 = vector.shape_cast %110 : vector<8xf32> to vector<8x1xf32>
    %cst_51 = arith.constant 3.200000e+01 : f32
    %112 = vector.broadcast %cst_51 : f32 to vector<8x1xf32>
    %113 = arith.divf %111, %112 : vector<8x1xf32>
    %cst_52 = arith.constant 9.99999997E-7 : f32
    %114 = vector.broadcast %cst_52 : f32 to vector<8x1xf32>
    %115 = arith.addf %113, %114 : vector<8x1xf32>
    %116 = math.rsqrt %115 : vector<8x1xf32>
    %117 = vector.broadcast %116 : vector<8x1xf32> to vector<8x32xf32>
    %118 = arith.mulf %107, %117 : vector<8x32xf32>
    %119 = vector.broadcast %108 : vector<1x32xf32> to vector<8x32xf32>
    %120 = arith.mulf %118, %119 : vector<8x32xf32>
    %c0_53 = arith.constant 0 : index
    %c0_54 = arith.constant 0 : index
    %121 = vector.load %arg14[%c0_53, %c0_54] : memref<1x32xf32, #tpu.memory_space<vmem>>, vector<1x32xf32>
    %122 = arith.mulf %3, %3 : vector<8x32xf32>
    %cst_55 = arith.constant dense<0.000000e+00> : vector<8xf32>
    %123 = vector.multi_reduction <add>, %122, %cst_55 [1] : vector<8x32xf32> to vector<8xf32>
    %124 = vector.shape_cast %123 : vector<8xf32> to vector<8x1xf32>
    %cst_56 = arith.constant 3.200000e+01 : f32
    %125 = vector.broadcast %cst_56 : f32 to vector<8x1xf32>
    %126 = arith.divf %124, %125 : vector<8x1xf32>
    %cst_57 = arith.constant 9.99999997E-7 : f32
    %127 = vector.broadcast %cst_57 : f32 to vector<8x1xf32>
    %128 = arith.addf %126, %127 : vector<8x1xf32>
    %129 = math.rsqrt %128 : vector<8x1xf32>
    %130 = vector.broadcast %129 : vector<8x1xf32> to vector<8x32xf32>
    %131 = arith.mulf %3, %130 : vector<8x32xf32>
    %132 = vector.broadcast %121 : vector<1x32xf32> to vector<8x32xf32>
    %133 = arith.mulf %131, %132 : vector<8x32xf32>
    %c0_58 = arith.constant 0 : index
    %c0_59 = arith.constant 0 : index
    %134 = vector.load %arg15[%c0_58, %c0_59] : memref<32x96xf32, #tpu.memory_space<vmem>>, vector<32x96xf32>
    %cst_60 = arith.constant dense<0.000000e+00> : vector<8x96xf32>
    %135 = tpu.matmul %133, %134, %cst_60 {dimension_numbers = #tpu.dot_dimension_numbers<[1], [0], [0], [1], [0, 0, 1, 1], [], []>} : vector<8x32xf32>, vector<32x96xf32>, vector<8x96xf32> -> vector<8x96xf32>
    %136 = vector.extract_strided_slice %135 {offsets = [0, 0], sizes = [8, 32], strides = [1, 1]} : vector<8x96xf32> to vector<8x32xf32>
    %137 = vector.extract_strided_slice %135 {offsets = [0, 32], sizes = [8, 32], strides = [1, 1]} : vector<8x96xf32> to vector<8x32xf32>
    %138 = vector.extract_strided_slice %135 {offsets = [0, 64], sizes = [8, 32], strides = [1, 1]} : vector<8x96xf32> to vector<8x32xf32>
    %139 = vector.extract_strided_slice %136 {offsets = [0, 0], sizes = [8, 16], strides = [1, 1]} : vector<8x32xf32> to vector<8x16xf32>
    %140 = vector.extract_strided_slice %137 {offsets = [0, 0], sizes = [8, 16], strides = [1, 1]} : vector<8x32xf32> to vector<8x16xf32>
    %141 = vector.extract_strided_slice %138 {offsets = [0, 0], sizes = [8, 16], strides = [1, 1]} : vector<8x32xf32> to vector<8x16xf32>
    %142 = tpu.transpose %140, [1, 0] : vector<8x16xf32> -> vector<16x8xf32>
    %cst_61 = arith.constant dense<0.000000e+00> : vector<8x8xf32>
    %143 = tpu.matmul %139, %142, %cst_61 {dimension_numbers = #tpu.dot_dimension_numbers<[1], [0], [0], [1], [0, 0, 1, 1], [], []>} : vector<8x16xf32>, vector<16x8xf32>, vector<8x8xf32> -> vector<8x8xf32>
    %c0_62 = arith.constant 0 : index
    %c0_63 = arith.constant 0 : index
    %c0_64 = arith.constant 0 : index
    %144 = vector.load %arg5[%c0_62, %c0_63, %c0_64] : memref<2x8x8xf32, #tpu.memory_space<vmem>>, vector<1x8x8xf32>
    %145 = vector.shape_cast %144 : vector<1x8x8xf32> to vector<8x8xf32>
    %146 = arith.addf %143, %145 : vector<8x8xf32>
    %cst_65 = arith.constant dense<0xFF800000> : vector<8xf32>
    %147 = vector.multi_reduction <maximumf>, %146, %cst_65 [1] : vector<8x8xf32> to vector<8xf32>
    %148 = vector.shape_cast %147 : vector<8xf32> to vector<8x1xf32>
    %149 = vector.broadcast %148 : vector<8x1xf32> to vector<8x8xf32>
    %150 = arith.subf %146, %149 : vector<8x8xf32>
    %151 = math.exp %150 : vector<8x8xf32>
    %cst_66 = arith.constant dense<0.000000e+00> : vector<8xf32>
    %152 = vector.multi_reduction <add>, %151, %cst_66 [1] : vector<8x8xf32> to vector<8xf32>
    %153 = vector.shape_cast %152 : vector<8xf32> to vector<8x1xf32>
    %154 = tpu.reciprocal %153 {approx = true} : vector<8x1xf32> -> vector<8x1xf32>
    %155 = vector.broadcast %154 : vector<8x1xf32> to vector<8x8xf32>
    %156 = arith.mulf %151, %155 : vector<8x8xf32>
    %cst_67 = arith.constant dense<0.000000e+00> : vector<8x16xf32>
    %157 = tpu.matmul %156, %141, %cst_67 {dimension_numbers = #tpu.dot_dimension_numbers<[1], [0], [0], [1], [0, 0, 1, 1], [], []>} : vector<8x8xf32>, vector<8x16xf32>, vector<8x16xf32> -> vector<8x16xf32>
    %158 = vector.extract_strided_slice %136 {offsets = [0, 16], sizes = [8, 16], strides = [1, 1]} : vector<8x32xf32> to vector<8x16xf32>
    %159 = vector.extract_strided_slice %137 {offsets = [0, 16], sizes = [8, 16], strides = [1, 1]} : vector<8x32xf32> to vector<8x16xf32>
    %160 = vector.extract_strided_slice %138 {offsets = [0, 16], sizes = [8, 16], strides = [1, 1]} : vector<8x32xf32> to vector<8x16xf32>
    %161 = tpu.transpose %159, [1, 0] : vector<8x16xf32> -> vector<16x8xf32>
    %cst_68 = arith.constant dense<0.000000e+00> : vector<8x8xf32>
    %162 = tpu.matmul %158, %161, %cst_68 {dimension_numbers = #tpu.dot_dimension_numbers<[1], [0], [0], [1], [0, 0, 1, 1], [], []>} : vector<8x16xf32>, vector<16x8xf32>, vector<8x8xf32> -> vector<8x8xf32>
    %c1_69 = arith.constant 1 : index
    %c0_70 = arith.constant 0 : index
    %c0_71 = arith.constant 0 : index
    %163 = vector.load %arg5[%c1_69, %c0_70, %c0_71] : memref<2x8x8xf32, #tpu.memory_space<vmem>>, vector<1x8x8xf32>
    %164 = vector.shape_cast %163 : vector<1x8x8xf32> to vector<8x8xf32>
    %165 = arith.addf %162, %164 : vector<8x8xf32>
    %cst_72 = arith.constant dense<0xFF800000> : vector<8xf32>
    %166 = vector.multi_reduction <maximumf>, %165, %cst_72 [1] : vector<8x8xf32> to vector<8xf32>
    %167 = vector.shape_cast %166 : vector<8xf32> to vector<8x1xf32>
    %168 = vector.broadcast %167 : vector<8x1xf32> to vector<8x8xf32>
    %169 = arith.subf %165, %168 : vector<8x8xf32>
    %170 = math.exp %169 : vector<8x8xf32>
    %cst_73 = arith.constant dense<0.000000e+00> : vector<8xf32>
    %171 = vector.multi_reduction <add>, %170, %cst_73 [1] : vector<8x8xf32> to vector<8xf32>
    %172 = vector.shape_cast %171 : vector<8xf32> to vector<8x1xf32>
    %173 = tpu.reciprocal %172 {approx = true} : vector<8x1xf32> -> vector<8x1xf32>
    %174 = vector.broadcast %173 : vector<8x1xf32> to vector<8x8xf32>
    %175 = arith.mulf %170, %174 : vector<8x8xf32>
    %cst_74 = arith.constant dense<0.000000e+00> : vector<8x16xf32>
    %176 = tpu.matmul %175, %160, %cst_74 {dimension_numbers = #tpu.dot_dimension_numbers<[1], [0], [0], [1], [0, 0, 1, 1], [], []>} : vector<8x8xf32>, vector<8x16xf32>, vector<8x16xf32> -> vector<8x16xf32>
    %177 = tpu.concatenate %157, %176 in 1 : vector<8x16xf32>, vector<8x16xf32> -> vector<8x32xf32>
    %c0_75 = arith.constant 0 : index
    %c0_76 = arith.constant 0 : index
    %178 = vector.load %arg16[%c0_75, %c0_76] : memref<32x32xf32, #tpu.memory_space<vmem>>, vector<32x32xf32>
    %cst_77 = arith.constant dense<0.000000e+00> : vector<8x32xf32>
    %179 = tpu.matmul %177, %178, %cst_77 {dimension_numbers = #tpu.dot_dimension_numbers<[1], [0], [0], [1], [0, 0, 1, 1], [], []>} : vector<8x32xf32>, vector<32x32xf32>, vector<8x32xf32> -> vector<8x32xf32>
    %180 = arith.addf %3, %179 : vector<8x32xf32>
    %c0_78 = arith.constant 0 : index
    %c0_79 = arith.constant 0 : index
    %181 = vector.load %arg17[%c0_78, %c0_79] : memref<1x32xf32, #tpu.memory_space<vmem>>, vector<1x32xf32>
    %182 = arith.mulf %180, %180 : vector<8x32xf32>
    %cst_80 = arith.constant dense<0.000000e+00> : vector<8xf32>
    %183 = vector.multi_reduction <add>, %182, %cst_80 [1] : vector<8x32xf32> to vector<8xf32>
    %184 = vector.shape_cast %183 : vector<8xf32> to vector<8x1xf32>
    %cst_81 = arith.constant 3.200000e+01 : f32
    %185 = vector.broadcast %cst_81 : f32 to vector<8x1xf32>
    %186 = arith.divf %184, %185 : vector<8x1xf32>
    %cst_82 = arith.constant 9.99999997E-7 : f32
    %187 = vector.broadcast %cst_82 : f32 to vector<8x1xf32>
    %188 = arith.addf %186, %187 : vector<8x1xf32>
    %189 = math.rsqrt %188 : vector<8x1xf32>
    %190 = vector.broadcast %189 : vector<8x1xf32> to vector<8x32xf32>
    %191 = arith.mulf %180, %190 : vector<8x32xf32>
    %192 = vector.broadcast %181 : vector<1x32xf32> to vector<8x32xf32>
    %193 = arith.mulf %191, %192 : vector<8x32xf32>
    %c0_83 = arith.constant 0 : index
    %c0_84 = arith.constant 0 : index
    %194 = vector.load %arg18[%c0_83, %c0_84] : memref<32x32xf32, #tpu.memory_space<vmem>>, vector<32x32xf32>
    %cst_85 = arith.constant dense<0.000000e+00> : vector<8x32xf32>
    %195 = tpu.matmul %193, %194, %cst_85 {dimension_numbers = #tpu.dot_dimension_numbers<[1], [0], [0], [1], [0, 0, 1, 1], [], []>} : vector<8x32xf32>, vector<32x32xf32>, vector<8x32xf32> -> vector<8x32xf32>
    %c0_86 = arith.constant 0 : index
    %c0_87 = arith.constant 0 : index
    %196 = vector.load %arg19[%c0_86, %c0_87] : memref<32x64xf32, #tpu.memory_space<vmem>>, vector<32x64xf32>
    %cst_88 = arith.constant dense<0.000000e+00> : vector<8x64xf32>
    %197 = tpu.matmul %120, %196, %cst_88 {dimension_numbers = #tpu.dot_dimension_numbers<[1], [0], [0], [1], [0, 0, 1, 1], [], []>} : vector<8x32xf32>, vector<32x64xf32>, vector<8x64xf32> -> vector<8x64xf32>
    %198 = vector.extract_strided_slice %197 {offsets = [0, 0], sizes = [8, 32], strides = [1, 1]} : vector<8x64xf32> to vector<8x32xf32>
    %199 = vector.extract_strided_slice %197 {offsets = [0, 32], sizes = [8, 32], strides = [1, 1]} : vector<8x64xf32> to vector<8x32xf32>
    %200 = vector.extract_strided_slice %195 {offsets = [0, 0], sizes = [8, 16], strides = [1, 1]} : vector<8x32xf32> to vector<8x16xf32>
    %201 = vector.extract_strided_slice %198 {offsets = [0, 0], sizes = [8, 16], strides = [1, 1]} : vector<8x32xf32> to vector<8x16xf32>
    %202 = vector.extract_strided_slice %199 {offsets = [0, 0], sizes = [8, 16], strides = [1, 1]} : vector<8x32xf32> to vector<8x16xf32>
    %203 = tpu.transpose %201, [1, 0] : vector<8x16xf32> -> vector<16x8xf32>
    %cst_89 = arith.constant dense<0.000000e+00> : vector<8x8xf32>
    %204 = tpu.matmul %200, %203, %cst_89 {dimension_numbers = #tpu.dot_dimension_numbers<[1], [0], [0], [1], [0, 0, 1, 1], [], []>} : vector<8x16xf32>, vector<16x8xf32>, vector<8x8xf32> -> vector<8x8xf32>
    %205 = vector.broadcast %9 : vector<1x8xf32> to vector<8x8xf32>
    %206 = arith.addf %204, %205 : vector<8x8xf32>
    %cst_90 = arith.constant dense<0xFF800000> : vector<8xf32>
    %207 = vector.multi_reduction <maximumf>, %206, %cst_90 [1] : vector<8x8xf32> to vector<8xf32>
    %208 = vector.shape_cast %207 : vector<8xf32> to vector<8x1xf32>
    %209 = vector.broadcast %208 : vector<8x1xf32> to vector<8x8xf32>
    %210 = arith.subf %206, %209 : vector<8x8xf32>
    %211 = math.exp %210 : vector<8x8xf32>
    %cst_91 = arith.constant dense<0.000000e+00> : vector<8xf32>
    %212 = vector.multi_reduction <add>, %211, %cst_91 [1] : vector<8x8xf32> to vector<8xf32>
    %213 = vector.shape_cast %212 : vector<8xf32> to vector<8x1xf32>
    %214 = tpu.reciprocal %213 {approx = true} : vector<8x1xf32> -> vector<8x1xf32>
    %215 = vector.broadcast %214 : vector<8x1xf32> to vector<8x8xf32>
    %216 = arith.mulf %211, %215 : vector<8x8xf32>
    %cst_92 = arith.constant dense<0.000000e+00> : vector<8x16xf32>
    %217 = tpu.matmul %216, %202, %cst_92 {dimension_numbers = #tpu.dot_dimension_numbers<[1], [0], [0], [1], [0, 0, 1, 1], [], []>} : vector<8x8xf32>, vector<8x16xf32>, vector<8x16xf32> -> vector<8x16xf32>
    %218 = vector.extract_strided_slice %195 {offsets = [0, 16], sizes = [8, 16], strides = [1, 1]} : vector<8x32xf32> to vector<8x16xf32>
    %219 = vector.extract_strided_slice %198 {offsets = [0, 16], sizes = [8, 16], strides = [1, 1]} : vector<8x32xf32> to vector<8x16xf32>
    %220 = vector.extract_strided_slice %199 {offsets = [0, 16], sizes = [8, 16], strides = [1, 1]} : vector<8x32xf32> to vector<8x16xf32>
    %221 = tpu.transpose %219, [1, 0] : vector<8x16xf32> -> vector<16x8xf32>
    %cst_93 = arith.constant dense<0.000000e+00> : vector<8x8xf32>
    %222 = tpu.matmul %218, %221, %cst_93 {dimension_numbers = #tpu.dot_dimension_numbers<[1], [0], [0], [1], [0, 0, 1, 1], [], []>} : vector<8x16xf32>, vector<16x8xf32>, vector<8x8xf32> -> vector<8x8xf32>
    %223 = vector.broadcast %9 : vector<1x8xf32> to vector<8x8xf32>
    %224 = arith.addf %222, %223 : vector<8x8xf32>
    %cst_94 = arith.constant dense<0xFF800000> : vector<8xf32>
    %225 = vector.multi_reduction <maximumf>, %224, %cst_94 [1] : vector<8x8xf32> to vector<8xf32>
    %226 = vector.shape_cast %225 : vector<8xf32> to vector<8x1xf32>
    %227 = vector.broadcast %226 : vector<8x1xf32> to vector<8x8xf32>
    %228 = arith.subf %224, %227 : vector<8x8xf32>
    %229 = math.exp %228 : vector<8x8xf32>
    %cst_95 = arith.constant dense<0.000000e+00> : vector<8xf32>
    %230 = vector.multi_reduction <add>, %229, %cst_95 [1] : vector<8x8xf32> to vector<8xf32>
    %231 = vector.shape_cast %230 : vector<8xf32> to vector<8x1xf32>
    %232 = tpu.reciprocal %231 {approx = true} : vector<8x1xf32> -> vector<8x1xf32>
    %233 = vector.broadcast %232 : vector<8x1xf32> to vector<8x8xf32>
    %234 = arith.mulf %229, %233 : vector<8x8xf32>
    %cst_96 = arith.constant dense<0.000000e+00> : vector<8x16xf32>
    %235 = tpu.matmul %234, %220, %cst_96 {dimension_numbers = #tpu.dot_dimension_numbers<[1], [0], [0], [1], [0, 0, 1, 1], [], []>} : vector<8x8xf32>, vector<8x16xf32>, vector<8x16xf32> -> vector<8x16xf32>
    %236 = tpu.concatenate %217, %235 in 1 : vector<8x16xf32>, vector<8x16xf32> -> vector<8x32xf32>
    %c0_97 = arith.constant 0 : index
    %c0_98 = arith.constant 0 : index
    %237 = vector.load %arg20[%c0_97, %c0_98] : memref<32x32xf32, #tpu.memory_space<vmem>>, vector<32x32xf32>
    %cst_99 = arith.constant dense<0.000000e+00> : vector<8x32xf32>
    %238 = tpu.matmul %236, %237, %cst_99 {dimension_numbers = #tpu.dot_dimension_numbers<[1], [0], [0], [1], [0, 0, 1, 1], [], []>} : vector<8x32xf32>, vector<32x32xf32>, vector<8x32xf32> -> vector<8x32xf32>
    %239 = arith.addf %180, %238 : vector<8x32xf32>
    %c0_100 = arith.constant 0 : index
    %c0_101 = arith.constant 0 : index
    %240 = vector.load %arg21[%c0_100, %c0_101] : memref<1x32xf32, #tpu.memory_space<vmem>>, vector<1x32xf32>
    %241 = arith.mulf %239, %239 : vector<8x32xf32>
    %cst_102 = arith.constant dense<0.000000e+00> : vector<8xf32>
    %242 = vector.multi_reduction <add>, %241, %cst_102 [1] : vector<8x32xf32> to vector<8xf32>
    %243 = vector.shape_cast %242 : vector<8xf32> to vector<8x1xf32>
    %cst_103 = arith.constant 3.200000e+01 : f32
    %244 = vector.broadcast %cst_103 : f32 to vector<8x1xf32>
    %245 = arith.divf %243, %244 : vector<8x1xf32>
    %cst_104 = arith.constant 9.99999997E-7 : f32
    %246 = vector.broadcast %cst_104 : f32 to vector<8x1xf32>
    %247 = arith.addf %245, %246 : vector<8x1xf32>
    %248 = math.rsqrt %247 : vector<8x1xf32>
    %249 = vector.broadcast %248 : vector<8x1xf32> to vector<8x32xf32>
    %250 = arith.mulf %239, %249 : vector<8x32xf32>
    %251 = vector.broadcast %240 : vector<1x32xf32> to vector<8x32xf32>
    %252 = arith.mulf %250, %251 : vector<8x32xf32>
    %c0_105 = arith.constant 0 : index
    %c0_106 = arith.constant 0 : index
    %253 = vector.load %arg22[%c0_105, %c0_106] : memref<32x128xf32, #tpu.memory_space<vmem>>, vector<32x128xf32>
    %c0_107 = arith.constant 0 : index
    %c0_108 = arith.constant 0 : index
    %254 = vector.load %arg23[%c0_107, %c0_108] : memref<64x32xf32, #tpu.memory_space<vmem>>, vector<64x32xf32>
    %cst_109 = arith.constant dense<0.000000e+00> : vector<8x128xf32>
    %255 = tpu.matmul %252, %253, %cst_109 {dimension_numbers = #tpu.dot_dimension_numbers<[1], [0], [0], [1], [0, 0, 1, 1], [], []>} : vector<8x32xf32>, vector<32x128xf32>, vector<8x128xf32> -> vector<8x128xf32>
    %256 = vector.extract_strided_slice %255 {offsets = [0, 0], sizes = [8, 64], strides = [1, 1]} : vector<8x128xf32> to vector<8x64xf32>
    %257 = vector.extract_strided_slice %255 {offsets = [0, 64], sizes = [8, 64], strides = [1, 1]} : vector<8x128xf32> to vector<8x64xf32>
    %cst_110 = arith.constant 5.000000e-01 : f32
    %258 = vector.broadcast %cst_110 : f32 to vector<8x64xf32>
    %259 = arith.mulf %258, %256 : vector<8x64xf32>
    %260 = arith.mulf %256, %256 : vector<8x64xf32>
    %261 = arith.mulf %260, %256 : vector<8x64xf32>
    %cst_111 = arith.constant 4.471500e-02 : f32
    %262 = vector.broadcast %cst_111 : f32 to vector<8x64xf32>
    %263 = arith.mulf %262, %261 : vector<8x64xf32>
    %264 = arith.addf %256, %263 : vector<8x64xf32>
    %cst_112 = arith.constant 0.797884583 : f32
    %265 = vector.broadcast %cst_112 : f32 to vector<8x64xf32>
    %266 = arith.mulf %265, %264 : vector<8x64xf32>
    %267 = math.tanh %266 : vector<8x64xf32>
    %cst_113 = arith.constant 1.000000e+00 : f32
    %268 = vector.broadcast %cst_113 : f32 to vector<8x64xf32>
    %269 = arith.addf %268, %267 : vector<8x64xf32>
    %270 = arith.mulf %259, %269 : vector<8x64xf32>
    %271 = arith.mulf %270, %257 : vector<8x64xf32>
    %cst_114 = arith.constant dense<0.000000e+00> : vector<8x32xf32>
    %272 = tpu.matmul %271, %254, %cst_114 {dimension_numbers = #tpu.dot_dimension_numbers<[1], [0], [0], [1], [0, 0, 1, 1], [], []>} : vector<8x64xf32>, vector<64x32xf32>, vector<8x32xf32> -> vector<8x32xf32>
    %273 = arith.addf %239, %272 : vector<8x32xf32>
    %c0_115 = arith.constant 0 : index
    %c0_116 = arith.constant 0 : index
    %274 = vector.load %arg24[%c0_115, %c0_116] : memref<1x32xf32, #tpu.memory_space<vmem>>, vector<1x32xf32>
    %275 = arith.mulf %273, %273 : vector<8x32xf32>
    %cst_117 = arith.constant dense<0.000000e+00> : vector<8xf32>
    %276 = vector.multi_reduction <add>, %275, %cst_117 [1] : vector<8x32xf32> to vector<8xf32>
    %277 = vector.shape_cast %276 : vector<8xf32> to vector<8x1xf32>
    %cst_118 = arith.constant 3.200000e+01 : f32
    %278 = vector.broadcast %cst_118 : f32 to vector<8x1xf32>
    %279 = arith.divf %277, %278 : vector<8x1xf32>
    %cst_119 = arith.constant 9.99999997E-7 : f32
    %280 = vector.broadcast %cst_119 : f32 to vector<8x1xf32>
    %281 = arith.addf %279, %280 : vector<8x1xf32>
    %282 = math.rsqrt %281 : vector<8x1xf32>
    %283 = vector.broadcast %282 : vector<8x1xf32> to vector<8x32xf32>
    %284 = arith.mulf %273, %283 : vector<8x32xf32>
    %285 = vector.broadcast %274 : vector<1x32xf32> to vector<8x32xf32>
    %286 = arith.mulf %284, %285 : vector<8x32xf32>
    %c0_120 = arith.constant 0 : index
    %c0_121 = arith.constant 0 : index
    %287 = vector.load %arg25[%c0_120, %c0_121] : memref<32x128xf32, #tpu.memory_space<vmem>>, vector<32x128xf32>
    %cst_122 = arith.constant dense<0.000000e+00> : vector<8x128xf32>
    %288 = tpu.matmul %286, %287, %cst_122 {dimension_numbers = #tpu.dot_dimension_numbers<[1], [0], [0], [1], [0, 0, 1, 1], [], []>} : vector<8x32xf32>, vector<32x128xf32>, vector<8x128xf32> -> vector<8x128xf32>
    %c0_123 = arith.constant 0 : index
    %c0_124 = arith.constant 0 : index
    %c0_125 = arith.constant 0 : index
    %289 = vector.load %arg26[%c0_123, %c0_124, %c0_125] : memref<1x8x128xf32, #tpu.memory_space<vmem>>, vector<1x8x128xf32>
    %290 = vector.shape_cast %289 : vector<1x8x128xf32> to vector<8x128xf32>
    %291 = vector.shape_cast %288 : vector<8x128xf32> to vector<1x8x128xf32>
    tpu.vector_store %arg26[%c0_123, %c0_124, %c0_125], %291 {strides = array<i32>} : memref<1x8x128xf32, #tpu.memory_space<vmem>>, vector<1x8x128xf32>,
    %c0_126 = arith.constant 0 : index
    %c0_127 = arith.constant 0 : index
    %c0_128 = arith.constant 0 : index
    %292 = vector.load %arg6[%c0_126, %c0_127, %c0_128] : memref<1x8x1xi32, #tpu.memory_space<vmem>>, vector<1x8x1xi32>
    %293 = vector.shape_cast %292 : vector<1x8x1xi32> to vector<8x1xi32>
    %cst_129 = arith.constant dense<0xFF800000> : vector<8xf32>
    %294 = vector.multi_reduction <maximumf>, %288, %cst_129 [1] : vector<8x128xf32> to vector<8xf32>
    %295 = vector.shape_cast %294 : vector<8xf32> to vector<8x1xf32>
    %296 = vector.broadcast %295 : vector<8x1xf32> to vector<8x128xf32>
    %297 = arith.subf %288, %296 : vector<8x128xf32>
    %298 = math.exp %297 : vector<8x128xf32>
    %cst_130 = arith.constant dense<0.000000e+00> : vector<8xf32>
    %299 = vector.multi_reduction <add>, %298, %cst_130 [1] : vector<8x128xf32> to vector<8xf32>
    %300 = vector.shape_cast %299 : vector<8xf32> to vector<8x1xf32>
    %301 = math.log %300 : vector<8x1xf32>
    %302 = arith.addf %295, %301 : vector<8x1xf32>
    %303 = tpu.iota {dimensions = array<i32: 1>} : vector<8x128xi32>
    %304 = vector.broadcast %293 : vector<8x1xi32> to vector<8x128xi32>
    %305 = arith.cmpi eq, %303, %304 : vector<8x128xi32>
    %306 = arith.extui %305 : vector<8x128xi1> to vector<8x128xi32>
    %307 = arith.sitofp %306 : vector<8x128xi32> to vector<8x128xf32>
    %308 = arith.mulf %288, %307 : vector<8x128xf32>
    %cst_131 = arith.constant dense<0.000000e+00> : vector<8xf32>
    %309 = vector.multi_reduction <add>, %308, %cst_131 [1] : vector<8x128xf32> to vector<8xf32>
    %310 = vector.shape_cast %309 : vector<8xf32> to vector<8x1xf32>
    %c-100_i32 = arith.constant -100 : i32
    %311 = vector.broadcast %c-100_i32 : i32 to vector<8x1xi32>
    %312 = arith.cmpi ne, %293, %311 : vector<8x1xi32>
    %313 = arith.extui %312 : vector<8x1xi1> to vector<8x1xi32>
    %314 = arith.sitofp %313 : vector<8x1xi32> to vector<8x1xf32>
    %315 = arith.subf %302, %310 : vector<8x1xf32>
    %316 = arith.mulf %315, %314 : vector<8x1xf32>
    %cst_132 = arith.constant dense<0.000000e+00> : vector<1xf32>
    %317 = vector.multi_reduction <add>, %316, %cst_132 [0] : vector<8x1xf32> to vector<1xf32>
    %318 = vector.shape_cast %317 : vector<1xf32> to vector<1x1xf32>
    %c0_133 = arith.constant 0 : index
    %c0_134 = arith.constant 0 : index
    %c0_135 = arith.constant 0 : index
    %319 = vector.load %arg28[%c0_133, %c0_134, %c0_135] : memref<1x1x1xf32, #tpu.memory_space<vmem>>, vector<1x1x1xf32>
    %320 = vector.shape_cast %319 : vector<1x1x1xf32> to vector<1x1xf32>
    %321 = vector.shape_cast %318 : vector<1x1xf32> to vector<1x1x1xf32>
    tpu.vector_store %arg28[%c0_133, %c0_134, %c0_135], %321 {strides = array<i32>} : memref<1x1x1xf32, #tpu.memory_space<vmem>>, vector<1x1x1xf32>,
    %cst_136 = arith.constant dense<0.000000e+00> : vector<1xf32>
    %322 = vector.multi_reduction <add>, %314, %cst_136 [0] : vector<8x1xf32> to vector<1xf32>
    %323 = vector.shape_cast %322 : vector<1xf32> to vector<1x1xf32>
    %c0_137 = arith.constant 0 : index
    %c0_138 = arith.constant 0 : index
    %c0_139 = arith.constant 0 : index
    %324 = vector.load %arg29[%c0_137, %c0_138, %c0_139] : memref<1x1x1xf32, #tpu.memory_space<vmem>>, vector<1x1x1xf32>
    %325 = vector.shape_cast %324 : vector<1x1x1xf32> to vector<1x1xf32>
    %326 = vector.shape_cast %323 : vector<1x1xf32> to vector<1x1x1xf32>
    tpu.vector_store %arg29[%c0_137, %c0_138, %c0_139], %326 {strides = array<i32>} : memref<1x1x1xf32, #tpu.memory_space<vmem>>, vector<1x1x1xf32>,
    %327 = vector.broadcast %295 : vector<8x1xf32> to vector<8x128xf32>
    %328 = arith.cmpf oeq, %288, %327 : vector<8x128xf32>
    %c128_i32 = arith.constant 128 : i32
    %329 = vector.broadcast %c128_i32 : i32 to vector<8x128xi32>
    %330 = arith.select %328, %303, %329 : vector<8x128xi1>, vector<8x128xi32>
    %cst_140 = arith.constant dense<2147483647> : vector<8xi32>
    %331 = vector.multi_reduction <minsi>, %330, %cst_140 [1] : vector<8x128xi32> to vector<8xi32>
    %332 = vector.shape_cast %331 : vector<8xi32> to vector<8x1xi32>
    %c0_141 = arith.constant 0 : index
    %c0_142 = arith.constant 0 : index
    %c0_143 = arith.constant 0 : index
    %333 = vector.load %arg27[%c0_141, %c0_142, %c0_143] : memref<1x8x1xi32, #tpu.memory_space<vmem>>, vector<1x8x1xi32>
    %334 = vector.shape_cast %333 : vector<1x8x1xi32> to vector<8x1xi32>
    %335 = vector.shape_cast %332 : vector<8x1xi32> to vector<1x8x1xi32>
    tpu.vector_store %arg27[%c0_141, %c0_142, %c0_143], %335 {strides = array<i32>} : memref<1x8x1xi32, #tpu.memory_space<vmem>>, vector<1x8x1xi32>,
    return
  }
  func.func @transform_0(%arg0: i32) -> (i32, i32, i32) {
    %c0_i32 = arith.constant 0 : i32
    %c0_i32_0 = arith.constant 0 : i32
    %c0_i32_1 = arith.constant 0 : i32
    return %arg0, %c0_i32, %c0_i32_0 : i32, i32, i32
  }
  func.func @transform_1(%arg0: i32) -> (i32, i32, i32) {
    %c0_i32 = arith.constant 0 : i32
    %c0_i32_0 = arith.constant 0 : i32
    %c0_i32_1 = arith.constant 0 : i32
    return %arg0, %c0_i32, %c0_i32_0 : i32, i32, i32
  }
  func.func @transform_2(%arg0: i32) -> (i32, i32, i32) {
    %c0_i32 = arith.constant 0 : i32
    %c0_i32_0 = arith.constant 0 : i32
    %c0_i32_1 = arith.constant 0 : i32
    return %arg0, %c0_i32, %c0_i32_0 : i32, i32, i32
  }
  func.func @transform_3(%arg0: i32) -> (i32, i32, i32) {
    %c0_i32 = arith.constant 0 : i32
    %c0_i32_0 = arith.constant 0 : i32
    %c0_i32_1 = arith.constant 0 : i32
    %c0_i32_2 = arith.constant 0 : i32
    return %c0_i32, %c0_i32_0, %c0_i32_1 : i32, i32, i32
  }
  func.func @transform_4(%arg0: i32) -> (i32, i32, i32) {
    %c0_i32 = arith.constant 0 : i32
    %c0_i32_0 = arith.constant 0 : i32
    %c0_i32_1 = arith.constant 0 : i32
    %c0_i32_2 = arith.constant 0 : i32
    return %c0_i32, %c0_i32_0, %c0_i32_1 : i32, i32, i32
  }
  func.func @transform_5(%arg0: i32) -> (i32, i32, i32) {
    %c0_i32 = arith.constant 0 : i32
    %c0_i32_0 = arith.constant 0 : i32
    %c0_i32_1 = arith.constant 0 : i32
    return %arg0, %c0_i32, %c0_i32_0 : i32, i32, i32
  }
  func.func @transform_6(%arg0: i32) -> (i32, i32) {
    %c0_i32 = arith.constant 0 : i32
    %c0_i32_0 = arith.constant 0 : i32
    %c0_i32_1 = arith.constant 0 : i32
    return %c0_i32, %c0_i32_0 : i32, i32
  }
  func.func @transform_7(%arg0: i32) -> (i32, i32) {
    %c0_i32 = arith.constant 0 : i32
    %c0_i32_0 = arith.constant 0 : i32
    %c0_i32_1 = arith.constant 0 : i32
    return %c0_i32, %c0_i32_0 : i32, i32
  }
  func.func @transform_8(%arg0: i32) -> (i32, i32) {
    %c0_i32 = arith.constant 0 : i32
    %c0_i32_0 = arith.constant 0 : i32
    %c0_i32_1 = arith.constant 0 : i32
    return %c0_i32, %c0_i32_0 : i32, i32
  }
  func.func @transform_9(%arg0: i32) -> (i32, i32) {
    %c0_i32 = arith.constant 0 : i32
    %c0_i32_0 = arith.constant 0 : i32
    %c0_i32_1 = arith.constant 0 : i32
    return %c0_i32, %c0_i32_0 : i32, i32
  }
  func.func @transform_10(%arg0: i32) -> (i32, i32) {
    %c0_i32 = arith.constant 0 : i32
    %c0_i32_0 = arith.constant 0 : i32
    %c0_i32_1 = arith.constant 0 : i32
    return %c0_i32, %c0_i32_0 : i32, i32
  }
  func.func @transform_11(%arg0: i32) -> (i32, i32) {
    %c0_i32 = arith.constant 0 : i32
    %c0_i32_0 = arith.constant 0 : i32
    %c0_i32_1 = arith.constant 0 : i32
    return %c0_i32, %c0_i32_0 : i32, i32
  }
  func.func @transform_12(%arg0: i32) -> (i32, i32) {
    %c0_i32 = arith.constant 0 : i32
    %c0_i32_0 = arith.constant 0 : i32
    %c0_i32_1 = arith.constant 0 : i32
    return %c0_i32, %c0_i32_0 : i32, i32
  }
  func.func @transform_13(%arg0: i32) -> (i32, i32) {
    %c0_i32 = arith.constant 0 : i32
    %c0_i32_0 = arith.constant 0 : i32
    %c0_i32_1 = arith.constant 0 : i32
    return %c0_i32, %c0_i32_0 : i32, i32
  }
  func.func @transform_14(%arg0: i32) -> (i32, i32) {
    %c0_i32 = arith.constant 0 : i32
    %c0_i32_0 = arith.constant 0 : i32
    %c0_i32_1 = arith.constant 0 : i32
    return %c0_i32, %c0_i32_0 : i32, i32
  }
  func.func @transform_15(%arg0: i32) -> (i32, i32) {
    %c0_i32 = arith.constant 0 : i32
    %c0_i32_0 = arith.constant 0 : i32
    %c0_i32_1 = arith.constant 0 : i32
    return %c0_i32, %c0_i32_0 : i32, i32
  }
  func.func @transform_16(%arg0: i32) -> (i32, i32) {
    %c0_i32 = arith.constant 0 : i32
    %c0_i32_0 = arith.constant 0 : i32
    %c0_i32_1 = arith.constant 0 : i32
    return %c0_i32, %c0_i32_0 : i32, i32
  }
  func.func @transform_17(%arg0: i32) -> (i32, i32) {
    %c0_i32 = arith.constant 0 : i32
    %c0_i32_0 = arith.constant 0 : i32
    %c0_i32_1 = arith.constant 0 : i32
    return %c0_i32, %c0_i32_0 : i32, i32
  }
  func.func @transform_18(%arg0: i32) -> (i32, i32) {
    %c0_i32 = arith.constant 0 : i32
    %c0_i32_0 = arith.constant 0 : i32
    %c0_i32_1 = arith.constant 0 : i32
    return %c0_i32, %c0_i32_0 : i32, i32
  }
  func.func @transform_19(%arg0: i32) -> (i32, i32) {
    %c0_i32 = arith.constant 0 : i32
    %c0_i32_0 = arith.constant 0 : i32
    %c0_i32_1 = arith.constant 0 : i32
    return %c0_i32, %c0_i32_0 : i32, i32
  }
  func.func @transform_20(%arg0: i32) -> (i32, i32) {
    %c0_i32 = arith.constant 0 : i32
    %c0_i32_0 = arith.constant 0 : i32
    %c0_i32_1 = arith.constant 0 : i32
    return %c0_i32, %c0_i32_0 : i32, i32
  }
  func.func @transform_21(%arg0: i32) -> (i32, i32) {
    %c0_i32 = arith.constant 0 : i32
    %c0_i32_0 = arith.constant 0 : i32
    %c0_i32_1 = arith.constant 0 : i32
    return %c0_i32, %c0_i32_0 : i32, i32
  }
  func.func @transform_22(%arg0: i32) -> (i32, i32) {
    %c0_i32 = arith.constant 0 : i32
    %c0_i32_0 = arith.constant 0 : i32
    %c0_i32_1 = arith.constant 0 : i32
    return %c0_i32, %c0_i32_0 : i32, i32
  }
  func.func @transform_23(%arg0: i32) -> (i32, i32) {
    %c0_i32 = arith.constant 0 : i32
    %c0_i32_0 = arith.constant 0 : i32
    %c0_i32_1 = arith.constant 0 : i32
    return %c0_i32, %c0_i32_0 : i32, i32
  }
  func.func @transform_24(%arg0: i32) -> (i32, i32) {
    %c0_i32 = arith.constant 0 : i32
    %c0_i32_0 = arith.constant 0 : i32
    %c0_i32_1 = arith.constant 0 : i32
    return %c0_i32, %c0_i32_0 : i32, i32
  }
  func.func @transform_25(%arg0: i32) -> (i32, i32, i32) {
    %c0_i32 = arith.constant 0 : i32
    %c0_i32_0 = arith.constant 0 : i32
    %c0_i32_1 = arith.constant 0 : i32
    return %arg0, %c0_i32, %c0_i32_0 : i32, i32, i32
  }
  func.func @transform_26(%arg0: i32) -> (i32, i32, i32) {
    %c0_i32 = arith.constant 0 : i32
    %c0_i32_0 = arith.constant 0 : i32
    %c0_i32_1 = arith.constant 0 : i32
    return %arg0, %c0_i32, %c0_i32_0 : i32, i32, i32
  }
  func.func @transform_27(%arg0: i32) -> (i32, i32, i32) {
    %c0_i32 = arith.constant 0 : i32
    %c0_i32_0 = arith.constant 0 : i32
    %c0_i32_1 = arith.constant 0 : i32
    return %arg0, %c0_i32, %c0_i32_0 : i32, i32, i32
  }
  func.func @transform_28(%arg0: i32) -> (i32, i32, i32) {
    %c0_i32 = arith.constant 0 : i32
    %c0_i32_0 = arith.constant 0 : i32
    %c0_i32_1 = arith.constant 0 : i32
    return %arg0, %c0_i32, %c0_i32_0 : i32, i32, i32
  }
}

</mosaic_0001>

<bundles_post_ra>
// kernel: mt5_forward.1
= control target key start
LH: loop header
LB: loop body
LE: loop exit
PB: predicated region body
PF: predicated region fallthrough
CT: control target
= control target key end

     0   :  { %s4512_s0 = inlined_call_operand.vmem [shape: f32[2,8,32], index: 0, kind: input, shape index: {}]   ;;  %s4513_s1 = inlined_call_operand.vmem [shape: f32[2,8,32], index: 1, kind: input, shape index: {}]   ;;  %s4514_s2 = inlined_call_operand.vmem [shape: f32[2,1,8], index: 2, kind: input, shape index: {}]   ;;  %s4515_s3 = inlined_call_operand.vmem [shape: f32[2,8,8], index: 3, kind: input, shape index: {}]   ;;  %s4516_s4 = inlined_call_operand.vmem [shape: f32[2,8,8], index: 4, kind: input, shape index: {}]   ;;  %s4517_s5 = inlined_call_operand.vmem [shape: s32[2,8,1], index: 5, kind: input, shape index: {}]   ;;  %s4518_s6 = inlined_call_operand.vmem [shape: f32[1,32], index: 6, kind: input, shape index: {}]   ;;  %s4519_s7 = inlined_call_operand.vmem [shape: f32[32,96], index: 7, kind: input, shape index: {}]   ;;  %s4520_s8 = inlined_call_operand.vmem [shape: f32[32,32], index: 8, kind: input, shape index: {}]   ;;  %s4521_s9 = inlined_call_operand.vmem [shape: f32[1,32], index: 9, kind: input, shape index: {}]   ;;  %s4522_s10 = inlined_call_operand.vmem [shape: f32[32,128], index: 10, kind: input, shape index: {}]   ;;  %s4523_s11 = inlined_call_operand.vmem [shape: f32[64,32], index: 11, kind: input, shape index: {}]   ;;  %s4524_s12 = inlined_call_operand.vmem [shape: f32[1,32], index: 12, kind: input, shape index: {}]   ;;  %s4525_s13 = inlined_call_operand.vmem [shape: f32[1,32], index: 13, kind: input, shape index: {}]   ;;  %s4526_s14 = inlined_call_operand.vmem [shape: f32[32,96], index: 14, kind: input, shape index: {}]   ;;  %s4527_s15 = inlined_call_operand.vmem [shape: f32[32,32], index: 15, kind: input, shape index: {}]   ;;  %s4528_s16 = inlined_call_operand.vmem [shape: f32[1,32], index: 16, kind: input, shape index: {}]   ;;  %s4529_s17 = inlined_call_operand.vmem [shape: f32[32,32], index: 17, kind: input, shape index: {}]   ;;  %s4530_s18 = inlined_call_operand.vmem [shape: f32[32,64], index: 18, kind: input, shape index: {}]   ;;  %s4531_s19 = inlined_call_operand.vmem [shape: f32[32,32], index: 19, kind: input, shape index: {}]   ;;  %s4532_s20 = inlined_call_operand.vmem [shape: f32[1,32], index: 20, kind: input, shape index: {}]   ;;  %s4533_s21 = inlined_call_operand.vmem [shape: f32[32,128], index: 21, kind: input, shape index: {}]   ;;  %s4534_s22 = inlined_call_operand.vmem [shape: f32[64,32], index: 22, kind: input, shape index: {}]   ;;  %s4535_s23 = inlined_call_operand.vmem [shape: f32[1,32], index: 23, kind: input, shape index: {}]   ;;  %s4536_s24 = inlined_call_operand.vmem [shape: f32[32,128], index: 24, kind: input, shape index: {}]   ;;  %s4537_s25 = inlined_call_operand.hbm [shape: f32[2,8,128], index: 25, kind: output, shape index: {0}]   ;;  %s4538_s26 = inlined_call_operand.vmem [shape: s32[2,8,1], index: 26, kind: output, shape index: {1}]   ;;  %s4539_s27 = inlined_call_operand.vmem [shape: f32[2,1,1], index: 27, kind: output, shape index: {2}]   ;;  %s4540_s28 = inlined_call_operand.vmem [shape: f32[2,1,1], index: 28, kind: output, shape index: {3}]  }
   0x1   :  { %4570 = sst [smem:[#allocation11_spill]] %s4512_s0 }
   0x2   :  { %4571 = sst [smem:[#allocation12_spill]] %s4513_s1 }
   0x3   :  { %4572 = sst [smem:[#allocation13_spill]] %s4514_s2 }
   0x4   :  { %4573 = sst [smem:[#allocation14_spill]] %s4515_s3 }
   0x5   :  { %4574 = sst [smem:[#allocation15_spill]] %s4516_s4 }
   0x6   :  { %4575 = sst [smem:[#allocation16_spill]] %s4517_s5 }
   0x7   :  { %4576 = sst [smem:[#allocation17_spill]] %s4518_s6 }
   0x8   :  { %4577 = sst [smem:[#allocation18_spill]] %s4519_s7 }
   0x9   :  { %4578 = sst [smem:[#allocation19_spill]] %s4520_s8 }
   0xa   :  { %4579 = sst [smem:[#allocation20_spill]] %s4521_s9 }
   0xb   :  { %4580 = sst [smem:[#allocation21_spill]] %s4522_s10 }
   0xc   :  { %4581 = sst [smem:[#allocation22_spill]] %s4523_s11 }
   0xd   :  { %4582 = sst [smem:[#allocation23_spill]] %s4524_s12 }
   0xe   :  { %4583 = sst [smem:[#allocation24_spill]] %s4525_s13 }
   0xf   :  { %4584 = sst [smem:[#allocation25_spill]] %s4526_s14 }
  0x10   :  { %4585 = sst [smem:[#allocation26_spill]] %s4527_s15 }
  0x11   :  { %34 = vsyncpa [#allocation3], 0 }
  0x12   :  { %36 = vsyncpa [#allocation3 + $0x1], 0  ;;  %s3935_s8 = smov 0   ;;  %s3937_s5 = smov 0  }
  0x13   :  { %s3939_s9 = smov 0   ;;  %s3941_s30 = smov 0  }
  0x14 LB: > { %4586 = sst [smem:[#allocation5_spill]] %s3766_s8  ;;  %s3956_s3 = sadd.s32 4294967295, %s3778_s30   ;;  %s3778_s30 = sphi %s3941_s30, %s4620_s30   ;;  %s3774_s9 = sphi %s3939_s9, %s4622_s9   ;;  %s3770_s5 = sphi %s3937_s5, %s4624_s5   ;;  %s3766_s8 = sphi %s3935_s8, %s4623_s8  }
  0x15   : > { %4587 = sst [smem:[#allocation6_spill]] %s3774_s9  ;;  %s3268_s6 = sadd.s32 4294967294, %s3778_s30  }
  0x16   : > { %4588 = sst [smem:[#allocation7_spill]] %s3778_s30  ;;  %s3960_s10 = sadd.s32 1, %s3778_s30  }
  0x17   : > { %4589 = sst [smem:[#allocation8_spill]] %s3960_s10  ;;  %s594_s0 = sadd.s32 1, %s3774_s9 }
  0x18   : > { %s591_s11 = ssub.s32 %s3778_s30, %s3960_s10  ;;  %p604_p0 = scmp.ne.s32.totalorder %s3774_s9, %s3770_s5 }
  0x19   : > { %p592_p1 = scmp.eq.s32.totalorder %s591_s11, 0  ;;  %p605_p2 = scmp.eq.s32.totalorder %s3956_s3, 1 }
  0x1a   : > { %p610_p3 = scmp.ne.s32.totalorder %s3770_s5, %s3766_s8  ;;  %p611_p4 = scmp.eq.s32.totalorder %s3268_s6, 1 }
  0x1b   : > { %s3971_s29 = scalar_select %p592_p1, %s3774_s9, %s594_s0  }
  0x1c   : > { %p3973_p5 = por %p605_p2, %p604_p0  ;;  %p3977_p6 = por %p611_p4, %p610_p3 }
  0x1d   : > { %4590 = sst [smem:[#allocation9_spill]] %s3971_s29  ;;  %p3271_p7 = scmp.ge.s32.totalorder %s3778_s30, 1 }
  0x1e   : > { %s4592_s7 = scalar_select %p3977_p6, 1, 0 }
  0x1f   : > { %p797_p8 = scmp.lt.s32.totalorder %s3778_s30, 3 }
  0x20   : > { %4593 = sst [smem:[#allocation10_spill]] %s4592_s7 }
  0x21   : > { %p798_p9 = pnand %p3271_p7, %p797_p8 }
  0x22   : > { %p891_p10 = scmp.lt.s32.totalorder (!%p798_p9), %s3956_s3, 1  ;;  %s4594_s0 = sld [smem:[#allocation11_spill]] (!%p798_p9) }
  0x23   : > { %801 = sbr.rel (%p798_p9) target bundleno = 6471 (0x1947), region = 120  ;;  %s4595_s10 = sld [smem:[#allocation18_spill]] (!%p798_p9) }
  0x24   : > { %s4552_s4 = smov (!%p798_p9), 112   ;;  %s4597_s9 = sld [smem:[#allocation13_spill]] (!%p798_p9) }
  0x25   : > { %s4559_s6 = smov (!%p798_p9), 64   ;;  %s4556_s8 = smov (!%p798_p9), 80  }
  0x26   : > { %s4558_s7 = smov (!%p798_p9), 48   ;;  %s4604_s14 = sld [smem:[#allocation25_spill]] (!%p798_p9) }
  0x27   : > { %s4605_s13 = sld [smem:[#allocation24_spill]] (!%p798_p9) }
  0x28   : > { %s3985_s12 = scalar_select %p891_p10, %s3956_s3, 1  ;;  %vm923_vm0 = vcmask 261120   ;;  %v3780_v4 = vmov 0.0   ;;  %vm3781_vm1 = vmmov 0   ;;  %vm1027_vm2 = vcmask 130048  }
  0x29   : > { %v942_v3 = vld [vmem:[%s4595_s10 + $0x18] sm:$0xff]  ;;  %3414 = vmatprep.subr.mxu0 %v3780_v4  ;;  %v941_v5 = vld [vmem:[%s4595_s10 + $0x10] sm:$0xff]  ;;  %3422 = vmatprep.mubr.msk.f32.mxu0 %vm3781_vm1, %v3780_v4  ;;  %v940_v6 = vld [vmem:[%s4595_s10 + $0x8] sm:$0xff]  ;;  %v1018_v18 = vlaneseq  ;;  %vm1102_vm3 = vcmask 64512   ;;  %vm1556_vm4 = vcmask 523264   ;;  %s4613_s15 = sld [smem:[#allocation26_spill]] }
  0x2a   : > { %s3988_s1 = sshll.u32 %s3985_s12, 3  ;;  %3415 = vmatpush3.msra.mxu0 %v942_v3  ;;  %3425 = vmatprep.subr.mxu1 %v3780_v4  ;;  %v939_v7 = vld [vmem:[%s4595_s10] sm:$0xff]  ;;  %s901_s29 = scalar_lea.vmem %s4597_s9, %s3985_s12  ;;  %vm3046_vm8 = vcmask 7168   ;;  %vm3054_vm9 = vcmask 0  }
  0x2b   : > { %s894_s11 = scalar_lea.vmem %s4594_s0, %s3988_s1  ;;  %3416 = vmatprep.subr.mxu0 %v3780_v4  ;;  %3427 = vmatprep.mubr.msk.f32.mxu1 %vm3781_vm1, %v3780_v4  ;;  %s4596_s0 = sld [smem:[#allocation17_spill]]  ;;  %v918_v19 = vld [vmem:[%s901_s29] sm:$0x1]  ;;  %v1019_v21 = vshrl.u32 %v1018_v18, 7 }
  0x2c   : > { %v3994_v0 = vld [vmem:[%s894_s11] sm:$0xff]  ;;  %3417 = vmatpush3.msra.mxu0 %v941_v5  ;;  %s4554_s11 = smov 96   ;;  %v919_v20 = vsub.f32 1.0, %v918_v19  ;;  %s4599_s29 = sld [smem:[#allocation19_spill]] }
  0x2d   : > { %v922_v1 = vmul.f32 %v3994_v0, %v3994_v0  ;;  %3418 = vmatprep.subr.mxu0 %v3780_v4  ;;  %v1020_v23 = vsub.s32 0, %v1019_v21  ;;  %s4608_s9 = smov 80   ;;  %s4616_s30 = sld [smem:[#allocation16_spill]] }
  0x2e   : > { %3419 = vmatpush3.msra.mxu0 %v940_v6  ;;  %v920_v22 = vmul.f32 -1e+09, %v919_v20  ;;  %s872_s10 = sand.u32 1, %s3770_s5  }
  0x2f   : > { %v924_v2 = vsel %vm923_vm0, %v922_v1, 0.0  ;;  %3420 = vmatprep.subr.mxu0 %v3780_v4 }
  0x30   : > { %925 = vadd.xlane.f32.xlu0 %v924_v2  ;;  %3421 = vmatpush3.msra.mxu0 %v939_v7  ;;  %v4045_v24 = vrot.slane %v920_v22, %v1020_v23 }
  0x31   : > { %3445 = vmatprep.subr.mxu0 %v3780_v4  ;;  %v3277_v12 = vld [vmem:[%s4596_s0] ss:$0 sm:$0xff] }
  0x32   : > { %v1366_v59 = vld [vmem:[%s4599_s29 + $0x18] sm:$0xff]  ;;  %v1365_v60 = vld [vmem:[%s4599_s29 + $0x10] sm:$0xff]  ;;  %v1364_v61 = vld [vmem:[%s4599_s29 + $0x8] sm:$0xff] }
  0x33   : > { %v1363_v62 = vld [vmem:[%s4599_s29] sm:$0xff]  ;;  %s4607_s29 = smov 64  }
  0xb9   : > { %v926_v8 = vpop.xlane.xlu0 %925 }
  0xba   : > { %v928_v9 = vmul.f32 0.03125, %v926_v8 }
  0xbc   : > { %v929_v10 = vadd.f32 1e-06, %v928_v9 }
  0xbe   : > { %3672 = vrsqrt.f32 %v929_v10 }
  0xcb   : > { %v3673_v11 = vpop.eup %3672 }
  0xcc   : > { %v931_v13 = vmul.f32 %v3673_v11, %v3994_v0 }
  0xce   : > { %v938_v14 = vmul.f32 %v3277_v12, %v931_v13 }
  0xd0   : > { %3423 = vmatmul.mubr.msk.f32.vlgmr.msra.gmra.mxu0 %vm923_vm0, %v938_v14 }
  0xd1   : > { %3453 = vmatprep.mubr.msk.f32.mxu0 %vm3781_vm1, %v3780_v4  ;;  %3446 = vmatpush3.msra.mxu0 %v1366_v59 }
  0xd2   : > { %3447 = vmatprep.subr.mxu0 %v3780_v4 }
  0xd3   : > { %3448 = vmatpush3.msra.mxu0 %v1365_v60 }
  0xd4   : > { %3449 = vmatprep.subr.mxu0 %v3780_v4 }
  0xd5   : > { %3450 = vmatpush3.msra.mxu0 %v1364_v61 }
  0xd6   : > { %3451 = vmatprep.subr.mxu0 %v3780_v4 }
  0xd7   : > { %3452 = vmatpush3.msra.mxu0 %v1363_v62 }
  0xd8   : > { %3467 = vmatprep.subr.mxu0 %v3780_v4 }
 0x190   : > { %v4028_v15 = vpop.f32.mrf.mxu0 }
 0x191   : > { %1025 = vrot.lane.b32.xlu0 %v4028_v15, %s4554_s11  ;;  %s4561_s11 = smov 16  }
 0x192   : > { %v3424_v16 = vpop.f32.mrf.mxu0 }
 0x195   : > { %1193 = vrot.lane.b32.xlu0 %v4028_v15, %s4552_s4  ;;  %s4598_s4 = sld [smem:[#allocation14_spill]] }
 0x19b   : > { %v1016_v25 = vld [vmem:[%s4598_s4] sm:$0xff]  ;;  %v3282_v42 = vld [vmem:[%s4598_s4 + $0x8] sm:$0xff]  ;;  %s4614_s4 = smov 16  }
 0x19c   : > { %v1023_v26 = vadd.f32 %v4045_v24, %v1016_v25  ;;  %v1192_v44 = vadd.f32 %v3282_v42, %v4045_v24 }
 0x203   : > { %v1026_v17 = vpop.permute.xlu0 %1025 }
 0x204   : > { %3426 = vmatpush3.xpose.msk.msra.mxu1 %vm1027_vm2, %v1026_v17 }
 0x205   : > { %3430 = vmatprep.subr.mxu1 %v3780_v4 }
 0x207   : > { %3428 = vmatmul.mubr.msk.f32.vlgmr.msra.gmra.mxu1 %vm1027_vm2, %v4028_v15  ;;  %v1194_v41 = vpop.permute.xlu0 %1193 }
 0x208   : > { %3432 = vmatprep.mubr.msk.f32.mxu1 %vm3781_vm1, %v3780_v4 }
 0x2c7   : > { %v1098_v27 = vpop.f32.mrf.mxu1 }
 0x2c8   : > { %v1099_v28 = vadd.f32 %v1098_v27, %v1023_v26 }
 0x2c9   : > { %v3429_v29 = vpop.f32.mrf.mxu1 }
 0x2ca   : > { %v1103_v30 = vsel %vm1102_vm3, %v1099_v28, -inf  ;;  %v1666_v29 = vld [vmem:[%s4604_s14 + $0x18] sm:$0xff] }
 0x2cb   : > { %1104 = vmax.xlane.f32.xlu1 %v1103_v30  ;;  %v1665_v30 = vld [vmem:[%s4604_s14 + $0x10] sm:$0xff] }
 0x2dc   : > { %1114 = vrot.lane.b32.xlu1 %v4028_v15, %s4559_s6  ;;  %s4606_s6 = sld [smem:[#allocation22_spill]] }
 0x2e2   : > { %v1462_v42 = vld [vmem:[%s4606_s6 + $0x8] sm:$0xff] }
 0x354   : > { %v1105_v31 = vpop.xlane.xlu1 %1104 }
 0x355   : > { %v1106_v32 = vsub.f32 %v1099_v28, %v1105_v31 }
 0x357   : > { %v1107_v33 = vmul.f32 1.442695, %v1106_v32  ;;  %v3291_v32 = vld [vmem:[%s4605_s13] ss:$0 sm:$0xff] }
 0x358   : > { %v1115_v34 = vpop.permute.xlu1 %1114 }
 0x359   : > { %3674 = vpow2.f32 %v1107_v33  ;;  %3431 = vmatpush3.msra.mxu1 %v1115_v34  ;;  %v1664_v33 = vld [vmem:[%s4604_s14 + $0x8] sm:$0xff]  ;;  %v1663_v34 = vld [vmem:[%s4604_s14] sm:$0xff] }
 0x35a   : > { %3435 = vmatprep.subr.mxu1 %v3780_v4 }
 0x366   : > { %v3675_v35 = vpop.eup %3674 }
 0x367   : > { %v1109_v36 = vsel %vm1102_vm3, %v3675_v35, 0.0 }
 0x368   : > { %1110 = vadd.xlane.f32.xlu1 %v1109_v36  ;;  %v1468_v36 = vld [vmem:[%s4606_s6 + $0x38] sm:$0xff] }
 0x379   : > { %1195 = vrot.lane.b32.xlu1 %v4028_v15, %s4556_s8  ;;  %s4601_s8 = sld [smem:[#allocation21_spill]] }
 0x37f   : > { %v1460_v13 = vld [vmem:[%s4601_s8 + $0x18] sm:$0xff] }
 0x3f1   : > { %v1111_v37 = vpop.xlane.xlu1 %1110 }
 0x3f2   : > { %3676 = vrcp.f32 %v1111_v37  ;;  %v1467_v37 = vld [vmem:[%s4606_s6 + $0x30] sm:$0xff] }
 0x3f5   : > { %v1196_v40 = vpop.permute.xlu1 %1195 }
 0x3ff   : > { %v3677_v38 = vpop.eup %3676 }
 0x400   : > { %v1113_v39 = vmul.f32 %v3677_v38, %v3675_v35  ;;  %v1466_v38 = vld [vmem:[%s4606_s6 + $0x28] sm:$0xff] }
 0x402   : > { %3433 = vmatmul.mubr.msk.f32.vlgmr.msra.gmra.mxu1 %vm1102_vm3, %v1113_v39  ;;  %v1465_v39 = vld [vmem:[%s4606_s6 + $0x20] sm:$0xff] }
 0x403   : > { %3436 = vmatpush3.xpose.msk.msra.mxu1 %vm1027_vm2, %v1196_v40  ;;  %3437 = vmatprep.mubr.msk.f32.mxu1 %vm3781_vm1, %v3780_v4  ;;  %v1464_v40 = vld [vmem:[%s4606_s6 + $0x18] sm:$0xff] }
 0x404   : > { %3440 = vmatprep.subr.mxu1 %v3780_v4 }
 0x406   : > { %3438 = vmatmul.mubr.msk.f32.vlgmr.msra.gmra.mxu1 %vm1027_vm2, %v1194_v41  ;;  %v1463_v41 = vld [vmem:[%s4606_s6 + $0x10] sm:$0xff] }
 0x407   : > { %3442 = vmatprep.mubr.msk.f32.mxu1 %vm3781_vm1, %v3780_v4 }
 0x4c2   : > { %v1186_v43 = vpop.f32.mrf.mxu1 }
 0x4c4   : > { %v3434_v45 = vpop.f32.mrf.mxu1 }
 0x4c6   : > { %v1267_v46 = vpop.f32.mrf.mxu1 }
 0x4c7   : > { %v1268_v47 = vadd.f32 %v1267_v46, %v1192_v44 }
 0x4c8   : > { %v3439_v48 = vpop.f32.mrf.mxu1 }
 0x4c9   : > { %v1271_v49 = vsel %vm1102_vm3, %v1268_v47, -inf }
 0x4ca   : > { %1272 = vmax.xlane.f32.xlu1 %v1271_v49 }
 0x553   : > { %v1273_v50 = vpop.xlane.xlu1 %1272 }
 0x554   : > { %v1274_v51 = vsub.f32 %v1268_v47, %v1273_v50 }
 0x556   : > { %v1275_v52 = vmul.f32 1.442695, %v1274_v51 }
 0x558   : > { %3678 = vpow2.f32 %v1275_v52 }
 0x565   : > { %v3679_v53 = vpop.eup %3678 }
 0x566   : > { %v1277_v54 = vsel %vm1102_vm3, %v3679_v53, 0.0 }
 0x567   : > { %1278 = vadd.xlane.f32.xlu0 %v1277_v54 }
 0x57d   : > { %1282 = vrot.lane.b32.xlu0 %v4028_v15, %s4558_s7  ;;  %s4600_s7 = sld [smem:[#allocation12_spill]] }
 0x583   : > { %s898_s0 = scalar_lea.vmem %s4600_s7, %s3988_s1  ;;  %s4602_s7 = smov %s4601_s8 }
 0x584   : > { %v4103_v5 = vld [vmem:[%s898_s0] sm:$0xff]  ;;  %v1459_v14 = vld [vmem:[%s4602_s7 + $0x10] sm:$0xff]  ;;  %s4609_s8 = smov 96   ;;  %s4610_s0 = smov 112  }
 0x585   : > { %v1648_v6 = vmul.f32 %v4103_v5, %v4103_v5  ;;  %v1457_v15 = vld [vmem:[%s4602_s7] sm:$0xff] }
 0x587   : > { %v1649_v7 = vsel %vm923_vm0, %v1648_v6, 0.0 }
 0x59c   : > { %1650 = vadd.xlane.f32.xlu0 %v1649_v7 }
 0x5f0   : > { %v1279_v55 = vpop.xlane.xlu0 %1278 }
 0x5f1   : > { %3680 = vrcp.f32 %v1279_v55 }
 0x5f4   : > { %v1283_v56 = vpop.permute.xlu0 %1282 }
 0x5f5   : > { %3441 = vmatpush3.msra.mxu1 %v1283_v56 }
 0x5f6   : > { %3456 = vmatprep.subr.mxu1 %v3780_v4 }
 0x5fe   : > { %v3681_v57 = vpop.eup %3680 }
 0x5ff   : > { %v1281_v58 = vmul.f32 %v3681_v57, %v3679_v53 }
 0x601   : > { %3443 = vmatmul.mubr.msk.f32.vlgmr.msra.gmra.mxu1 %vm1102_vm3, %v1281_v58 }
 0x602   : > { %3464 = vmatprep.mubr.msk.f32.mxu1 %vm3781_vm1, %v3780_v4  ;;  %3457 = vmatpush3.msra.mxu1 %v1460_v13 }
 0x603   : > { %3458 = vmatprep.subr.mxu1 %v3780_v4 }
 0x604   : > { %3459 = vmatpush3.msra.mxu1 %v1459_v14 }
 0x605   : > { %3460 = vmatprep.subr.mxu1 %v3780_v4 }
 0x625   : > { %v1651_v16 = vpop.xlane.xlu0 %1650 }
 0x626   : > { %v1652_v17 = vmul.f32 0.03125, %v1651_v16 }
 0x628   : > { %v1653_v22 = vadd.f32 1e-06, %v1652_v17 }
 0x6c1   : > { %v1354_v63 = vpop.f32.mrf.mxu1 }
 0x6c2   : > { %1359 = vrot.lane.b32.xlu1 %v1354_v63, %s4561_s11  ;;  %s4603_s11 = sld [smem:[#allocation20_spill]] }
 0x6c3   : > { %v3444_v1 = vpop.f32.mrf.mxu1 }
 0x6c8   : > { %v3287_v25 = vld [vmem:[%s4603_s11] ss:$0 sm:$0xff]  ;;  %s4611_s11 = sld [smem:[#allocation15_spill]] }
 0x6ce   : > { %v1740_v1 = vld [vmem:[%s4611_s11] sm:$0xff] }
 0x734   : > { %v1360_v2 = vpop.permute.xlu1 %1359 }
 0x735   : > { %v1362_v3 = vsel %vm1027_vm2, %v1186_v43, %v1360_v2  ;;  %v1461_v43 = vld [vmem:[%s4606_s6] sm:$0xff]  ;;  %v3296_v2 = vld [vmem:[%s4611_s11 + $0x8] sm:$0xff]  ;;  %s4612_s6 = smov 48  }
 0x736   : > { %3454 = vmatmul.mubr.msk.f32.vlgmr.msra.gmra.mxu0 %vm923_vm0, %v1362_v3 }
 0x737   : > { %3483 = vmatprep.mubr.msk.f32.mxu0 %vm3781_vm1, %v3780_v4  ;;  %3468 = vmatpush3.msra.mxu0 %v1468_v36  ;;  %v2077_v36 = vld [vmem:[%s4613_s15] sm:$0xff] }
 0x738   : > { %3469 = vmatprep.subr.mxu0 %v3780_v4 }
 0x739   : > { %3470 = vmatpush3.msra.mxu0 %v1467_v37 }
 0x73a   : > { %3471 = vmatprep.subr.mxu0 %v3780_v4 }
 0x73b   : > { %3472 = vmatpush3.msra.mxu0 %v1466_v38 }
 0x73c   : > { %3473 = vmatprep.subr.mxu0 %v3780_v4 }
 0x73d   : > { %3474 = vmatpush3.msra.mxu0 %v1465_v39 }
 0x73e   : > { %3475 = vmatprep.subr.mxu0 %v3780_v4 }
 0x73f   : > { %3476 = vmatpush3.msra.mxu0 %v1464_v40 }
 0x740   : > { %3477 = vmatprep.subr.mxu0 %v3780_v4 }
 0x741   : > { %3478 = vmatpush3.msra.mxu0 %v1463_v41 }
 0x742   : > { %3479 = vmatprep.subr.mxu0 %v3780_v4 }
 0x743   : > { %3480 = vmatpush3.msra.mxu0 %v1462_v42 }
 0x744   : > { %3481 = vmatprep.subr.mxu0 %v3780_v4 }
 0x745   : > { %3482 = vmatpush3.msra.mxu0 %v1461_v43 }
 0x746   : > { %3507 = vmatprep.subr.mxu0 %v3780_v4 }
 0x7f6   : > { %v1436_v8 = vpop.f32.mrf.mxu0 }
 0x7f7   : > { %v4109_v9 = vadd.f32 %v1436_v8, %v3994_v0  ;;  %v1458_v0 = vld [vmem:[%s4602_s7 + $0x8] sm:$0xff]  ;;  %s4445_s7 = sshll.u32 %s872_s10, 3 }
 0x7f8   : > { %v3455_v10 = vpop.f32.mrf.mxu0  ;;  %3461 = vmatpush3.msra.mxu1 %v1458_v0  ;;  %s874_s14 = scalar_lea.vmem [#allocation2], %s4445_s7 }
 0x7f9   : > { %v1442_v11 = vmul.f32 %v4109_v9, %v4109_v9  ;;  %3462 = vmatprep.subr.mxu1 %v3780_v4  ;;  %s3105_s13 = sshll.u32 %s874_s14, 4  ;;  %s3106_s13 = int_to_ptr.vmem [resolvable:$true] %s3105_s13 }
 0x7fa   : > { %3463 = vmatpush3.msra.mxu1 %v1457_v15 }
 0x7fb   : > { %v1443_v12 = vsel %vm923_vm0, %v1442_v11, 0.0  ;;  %3486 = vmatprep.subr.mxu1 %v3780_v4 }
 0x7fc   : > { %1444 = vadd.xlane.f32.xlu1 %v1443_v12 }
 0x885   : > { %v1445_v19 = vpop.xlane.xlu1 %1444 }
 0x886   : > { %v1446_v20 = vmul.f32 0.03125, %v1445_v19 }
 0x888   : > { %v1447_v21 = vadd.f32 1e-06, %v1446_v20 }
 0x88a   : > { %3682 = vrsqrt.f32 %v1447_v21 }
 0x88b   : > { %3684 = vrsqrt.f32 %v1653_v22 }
 0x897   : > { %v3683_v23 = vpop.eup %3682 }
 0x898   : > { %v1449_v26 = vmul.f32 %v3683_v23, %v4109_v9  ;;  %v3685_v27 = vpop.eup %3684 }
 0x899   : > { %v1655_v31 = vmul.f32 %v3685_v27, %v4103_v5 }
 0x89a   : > { %v1456_v28 = vmul.f32 %v3287_v25, %v1449_v26 }
 0x89b   : > { %v1662_v35 = vmul.f32 %v3291_v32, %v1655_v31 }
 0x89c   : > { %3465 = vmatmul.mubr.msk.f32.vlgmr.msra.gmra.mxu1 %vm923_vm0, %v1456_v28 }
 0x89d   : > { %3487 = vmatpush3.msra.mxu1 %v1666_v29  ;;  %3494 = vmatprep.mubr.msk.f32.mxu1 %vm3781_vm1, %v3780_v4 }
 0x89e   : > { %3488 = vmatprep.subr.mxu1 %v3780_v4 }
 0x89f   : > { %3489 = vmatpush3.msra.mxu1 %v1665_v30 }
 0x8a0   : > { %3490 = vmatprep.subr.mxu1 %v3780_v4 }
 0x8a1   : > { %3491 = vmatpush3.msra.mxu1 %v1664_v33  ;;  %v2080_v33 = vld [vmem:[%s4613_s15 + $0x18] sm:$0xff] }
 0x8a2   : > { %3492 = vmatprep.subr.mxu1 %v3780_v4 }
 0x8a3   : > { %3493 = vmatpush3.msra.mxu1 %v1663_v34  ;;  %v2079_v34 = vld [vmem:[%s4613_s15 + $0x10] sm:$0xff] }
 0x8a4   : > { %3495 = vmatmul.mubr.msk.f32.vlgmr.msra.gmra.mxu1 %vm923_vm0, %v1662_v35  ;;  %3497 = vmatprep.subr.mxu1 %v3780_v4  ;;  %v2078_v35 = vld [vmem:[%s4613_s15 + $0x8] sm:$0xff]  ;;  %s3789_s15 = smov [#allocation2]  }
 0x8a5   : > { %3499 = vmatprep.mubr.msk.f32.mxu1 %vm3781_vm1, %v3780_v4 }
 0x95c   : > { %v1538_v44 = vpop.f32.mrf.mxu1 }
 0x95d   : > { %1552 = vrot.lane.b32.xlu1 %v1538_v44, %s4607_s29  ;;  %v1543_v48 = vmul.f32 %v1538_v44, %v1538_v44  ;;  %v1542_v55 = vmul.f32 0.5, %v1538_v44 }
 0x95e   : > { %v3466_v45 = vpop.f32.mrf.mxu1 }
 0x95f   : > { %v1544_v49 = vmul.f32 %v1543_v48, %v1538_v44  ;;  %v2251_v45 = vld [vmem:[%s4530_s18 + $0x18] sm:$0xff]  ;;  %v2248_v48 = vld [vmem:[%s4530_s18] sm:$0xff] }
 0x961   : > { %v1545_v50 = vmul.f32 0.044715, %v1544_v49 }
 0x963   : > { %v1546_v51 = vadd.f32 %v1545_v50, %v1538_v44 }
 0x964   : > { %v1736_v46 = vpop.f32.mrf.mxu1 }
 0x965   : > { %1909 = vrot.lane.b32.xlu1 %v1736_v46, %s4608_s9  ;;  %1742 = vrot.lane.b32.xlu0 %v1736_v46, %s4609_s8  ;;  %v1547_v52 = vmul.f32 0.7978846, %v1546_v51 }
 0x966   : > { %v3496_v47 = vpop.f32.mrf.mxu1 }
 0x967   : > { %3686 = vtanh.f32 %v1547_v52  ;;  %v2250_v47 = vld [vmem:[%s4530_s18 + $0x10] sm:$0xff] }
 0x969   : > { %1907 = vrot.lane.b32.xlu0 %v1736_v46, %s4610_s0 }
 0x974   : > { %v3687_v53 = vpop.eup %3686 }
 0x975   : > { %v1549_v54 = vadd.f32 1.0, %v3687_v53 }
 0x977   : > { %v1550_v56 = vmul.f32 %v1549_v54, %v1542_v55 }
 0x9cf   : > { %v1553_v57 = vpop.permute.xlu1 %1552 }
 0x9d0   : > { %v1555_v58 = vmul.f32 %v1553_v57, %v1550_v56 }
 0x9d2   : > { %3484 = vmatmul.mubr.msk.f32.vlgmr.msra.gmra.mxu0 %vm1556_vm4, %v1555_v58 }
 0x9d3   : > { %3509 = vmatprep.mubr.msk.f32.mxu0 %vm3781_vm1, %v3780_v4 }
 0x9d7   : > { %v1910_v59 = vpop.permute.xlu1 %1909  ;;  %v1743_v60 = vpop.permute.xlu0 %1742 }
 0x9d8   : > { %3498 = vmatpush3.xpose.msk.msra.mxu1 %vm1027_vm2, %v1743_v60  ;;  %3508 = vmatpush3.xpose.msk.msra.mxu0 %vm1027_vm2, %v1910_v59 }
 0x9d9   : > { %3502 = vmatprep.subr.mxu1 %v3780_v4  ;;  %3517 = vmatprep.subr.mxu0 %v3780_v4 }
 0x9db   : > { %3500 = vmatmul.mubr.msk.f32.vlgmr.msra.gmra.mxu1 %vm1027_vm2, %v1736_v46  ;;  %v1908_v61 = vpop.permute.xlu0 %1907 }
 0x9dc   : > { %3510 = vmatmul.mubr.msk.f32.vlgmr.msra.gmra.mxu0 %vm1027_vm2, %v1908_v61  ;;  %3504 = vmatprep.mubr.msk.f32.mxu1 %vm3781_vm1, %v3780_v4  ;;  %v2174_v61 = vld [vmem:[%s4529_s17 + $0x18] sm:$0xff] }
 0x9dd   : > { %3525 = vmatprep.mubr.msk.f32.mxu0 %vm3781_vm1, %v3780_v4  ;;  %3518 = vmatpush3.msra.mxu0 %v2080_v33 }
 0x9de   : > { %3519 = vmatprep.subr.mxu0 %v3780_v4 }
 0x9df   : > { %3520 = vmatpush3.msra.mxu0 %v2079_v34 }
 0x9e0   : > { %3521 = vmatprep.subr.mxu0 %v3780_v4 }
 0x9e1   : > { %3522 = vmatpush3.msra.mxu0 %v2078_v35 }
 0x9e2   : > { %3523 = vmatprep.subr.mxu0 %v3780_v4 }
 0x9e3   : > { %3524 = vmatpush3.msra.mxu0 %v2077_v36 }
 0x9e4   : > { %3539 = vmatprep.subr.mxu0 %v3780_v4 }
 0xa92   : > { %v4209_v62 = vpop.f32.mrf.mxu0 }
 0xa93   : > { %v1630_v41 = vadd.f32 %v4209_v62, %v4109_v9  ;;  %v2249_v9 = vld [vmem:[%s4530_s18 + $0x8] sm:$0xff]  ;;  %v2173_v62 = vld [vmem:[%s4529_s17 + $0x10] sm:$0xff] }
 0xa94   : > { %v3485_v63 = vpop.f32.mrf.mxu0 }
 0xa95   : > { %v1632_v42 = vmul.f32 %v1630_v41, %v1630_v41  ;;  %v2171_v63 = vld [vmem:[%s4529_s17] sm:$0xff] }
 0xa97   : > { %v1633_v43 = vsel %vm923_vm0, %v1632_v42, 0.0 }
 0xa9b   : > { %v1814_v3 = vpop.f32.mrf.mxu1 }
 0xa9c   : > { %v1815_v6 = vadd.f32 %v1814_v3, %v1740_v1  ;;  %v1981_v7 = vpop.f32.mrf.mxu0 }
 0xa9d   : > { %v1982_v8 = vadd.f32 %v3296_v2, %v1981_v7  ;;  %v3501_v10 = vpop.f32.mrf.mxu1 }
 0xa9e   : > { %v3511_v11 = vpop.f32.mrf.mxu0  ;;  %v1818_v12 = vsel %vm1102_vm3, %v1815_v6, -inf  ;;  %v3301_v10 = vld [vmem:[%s4528_s16] ss:$0 sm:$0xff] }
 0xa9f   : > { %1819 = vmax.xlane.f32.xlu1 %v1818_v12  ;;  %v1985_v13 = vsel %vm1102_vm3, %v1982_v8, -inf }
 0xaa0   : > { %1986 = vmax.xlane.f32.xlu0 %v1985_v13 }
 0xab0   : > { %1829 = vrot.lane.b32.xlu1 %v1736_v46, %s4607_s29 }
 0xb28   : > { %v1820_v14 = vpop.xlane.xlu1 %1819 }
 0xb29   : > { %v1821_v0 = vsub.f32 %v1815_v6, %v1820_v14  ;;  %v1987_v15 = vpop.xlane.xlu0 %1986 }
 0xb2a   : > { %v1988_v16 = vsub.f32 %v1982_v8, %v1987_v15 }
 0xb2b   : > { %v1822_v17 = vmul.f32 1.442695, %v1821_v0 }
 0xb2c   : > { %v1989_v19 = vmul.f32 1.442695, %v1988_v16  ;;  %v1830_v20 = vpop.permute.xlu1 %1829 }
 0xb2d   : > { %3688 = vpow2.f32 %v1822_v17  ;;  %3503 = vmatpush3.msra.mxu1 %v1830_v20 }
 0xb2e   : > { %3512 = vmatprep.subr.mxu1 %v3780_v4  ;;  %3690 = vpow2.f32 %v1989_v19 }
 0xb3a   : > { %v3689_v21 = vpop.eup %3688 }
 0xb3b   : > { %v1824_v22 = vsel %vm1102_vm3, %v3689_v21, 0.0  ;;  %v3691_v23 = vpop.eup %3690 }
 0xb3c   : > { %1825 = vadd.xlane.f32.xlu0 %v1824_v22  ;;  %v1991_v25 = vsel %vm1102_vm3, %v3691_v23, 0.0 }
 0xb40   : > { %1992 = vadd.xlane.f32.xlu0 %v1991_v25 }
 0xb56   : > { %1996 = vrot.lane.b32.xlu0 %v1736_v46, %s4612_s6  ;;  %s4615_s6 = sld [smem:[#allocation23_spill]] }
 0xb5c   : > { %v3290_v53 = vld [vmem:[%s4615_s6] ss:$0 sm:$0xff]  ;;  %s3082_s6 = scalar_lea.sflag [#allocation3], %s872_s10 }
 0xbc5   : > { %v1826_v26 = vpop.xlane.xlu0 %1825 }
 0xbc6   : > { %3692 = vrcp.f32 %v1826_v26 }
 0xbc9   : > { %v1993_v27 = vpop.xlane.xlu0 %1992 }
 0xbca   : > { %3694 = vrcp.f32 %v1993_v27 }
 0xbcd   : > { %v1997_v30 = vpop.permute.xlu0 %1996 }
 0xbd3   : > { %v3693_v28 = vpop.eup %3692 }
 0xbd4   : > { %v1828_v29 = vmul.f32 %v3693_v28, %v3689_v21 }
 0xbd6   : > { %3505 = vmatmul.mubr.msk.f32.vlgmr.msra.gmra.mxu1 %vm1102_vm3, %v1828_v29 }
 0xbd7   : > { %v3695_v31 = vpop.eup %3694  ;;  %3513 = vmatpush3.msra.mxu1 %v1997_v30  ;;  %3514 = vmatprep.mubr.msk.f32.mxu1 %vm3781_vm1, %v3780_v4 }
 0xbd8   : > { %v1995_v32 = vmul.f32 %v3695_v31, %v3691_v23  ;;  %3528 = vmatprep.subr.mxu1 %v3780_v4 }
 0xbda   : > { %3515 = vmatmul.mubr.msk.f32.vlgmr.msra.gmra.mxu1 %vm1102_vm3, %v1995_v32 }
 0xbdb   : > { %3536 = vmatprep.mubr.msk.f32.mxu1 %vm3781_vm1, %v3780_v4  ;;  %3529 = vmatpush3.msra.mxu1 %v2174_v61 }
 0xbdc   : > { %3530 = vmatprep.subr.mxu1 %v3780_v4 }
 0xbdd   : > { %3531 = vmatpush3.msra.mxu1 %v2173_v62 }
 0xbde   : > { %3532 = vmatprep.subr.mxu1 %v3780_v4 }
 0xc96   : > { %v1901_v37 = vpop.f32.mrf.mxu1 }
 0xc98   : > { %v3506_v38 = vpop.f32.mrf.mxu1 }
 0xc9a   : > { %v2068_v39 = vpop.f32.mrf.mxu1 }
 0xc9b   : > { %2073 = vrot.lane.b32.xlu1 %v2068_v39, %s4614_s4 }
 0xc9c   : > { %v3516_v40 = vpop.f32.mrf.mxu1 }
 0xcbf   : > { %1634 = vadd.xlane.f32.xlu1 %v1633_v43  ;;  %v2661_v43 = vld [vmem:[%s4531_s19 + $0x18] sm:$0xff] }
 0xd0d   : > { %v2074_v44 = vpop.permute.xlu1 %2073 }
 0xd0e   : > { %v2076_v46 = vsel %vm1027_vm2, %v1901_v37, %v2074_v44  ;;  %v2660_v44 = vld [vmem:[%s4531_s19 + $0x10] sm:$0xff] }
 0xd0f   : > { %3526 = vmatmul.mubr.msk.f32.vlgmr.msra.gmra.mxu0 %vm923_vm0, %v2076_v46 }
 0xd10   : > { %3540 = vmatpush3.msra.mxu0 %v2251_v45  ;;  %3547 = vmatprep.mubr.msk.f32.mxu0 %vm3781_vm1, %v3780_v4  ;;  %v2659_v45 = vld [vmem:[%s4531_s19 + $0x8] sm:$0xff] }
 0xd11   : > { %3541 = vmatprep.subr.mxu0 %v3780_v4 }
 0xd12   : > { %3542 = vmatpush3.msra.mxu0 %v2250_v47 }
 0xd13   : > { %3543 = vmatprep.subr.mxu0 %v3780_v4 }
 0xd14   : > { %3544 = vmatpush3.msra.mxu0 %v2249_v9  ;;  %v2658_v9 = vld [vmem:[%s4531_s19] sm:$0xff] }
 0xd15   : > { %3545 = vmatprep.subr.mxu0 %v3780_v4 }
 0xd16   : > { %3546 = vmatpush3.msra.mxu0 %v2248_v48 }
 0xd17   : > { %3560 = vmatprep.subr.mxu0 %v3780_v4 }
 0xd48   : > { %v1635_v49 = vpop.xlane.xlu1 %1634 }
 0xd49   : > { %v1636_v50 = vmul.f32 0.03125, %v1635_v49 }
 0xd4b   : > { %v1637_v51 = vadd.f32 1e-06, %v1636_v50 }
 0xd4d   : > { %3696 = vrsqrt.f32 %v1637_v51 }
 0xd5a   : > { %v3697_v52 = vpop.eup %3696 }
 0xd5b   : > { %v1639_v54 = vmul.f32 %v3697_v52, %v1630_v41 }
 0xd5d   : > { %v1646_v55 = vmul.f32 %v3290_v53, %v1639_v54 }
 0xd5f   : > { %3548 = vmatmul.mubr.msk.f32.vlgmr.msra.gmra.mxu0 %vm923_vm0, %v1646_v55 }
 0xd60   : > { %3562 = vmatprep.mubr.msk.f32.mxu0 %vm3781_vm1, %v3780_v4 }
 0xdcf   : > { %v2150_v56 = vpop.f32.mrf.mxu0 }
 0xdd0   : > { %v4278_v57 = vadd.f32 %v2150_v56, %v4103_v5  ;;  %v2172_v5 = vld [vmem:[%s4529_s17 + $0x8] sm:$0xff] }
 0xdd1   : > { %v3527_v58 = vpop.f32.mrf.mxu0  ;;  %3533 = vmatpush3.msra.mxu1 %v2172_v5 }
 0xdd2   : > { %v2156_v59 = vmul.f32 %v4278_v57, %v4278_v57  ;;  %3534 = vmatprep.subr.mxu1 %v3780_v4  ;;  %v2755_v58 = vld [vmem:[%s4533_s21 + $0x18] sm:$0xff] }
 0xdd3   : > { %3535 = vmatpush3.msra.mxu1 %v2171_v63 }
 0xdd4   : > { %v2157_v60 = vsel %vm923_vm0, %v2156_v59, 0.0  ;;  %3550 = vmatprep.subr.mxu1 %v3780_v4  ;;  %v2754_v59 = vld [vmem:[%s4533_s21 + $0x10] sm:$0xff] }
 0xdd5   : > { %2158 = vadd.xlane.f32.xlu0 %v2157_v60  ;;  %v2752_v60 = vld [vmem:[%s4533_s21] sm:$0xff] }
 0xe1f   : > { %v2321_v1 = vpop.f32.mrf.mxu0 }
 0xe20   : > { %2490 = vrot.lane.b32.xlu0 %v2321_v1, %s4610_s0 }
 0xe21   : > { %v3549_v2 = vpop.f32.mrf.mxu0 }
 0xe5e   : > { %v2159_v3 = vpop.xlane.xlu0 %2158 }
 0xe5f   : > { %v2160_v6 = vmul.f32 0.03125, %v2159_v3 }
 0xe61   : > { %v2161_v7 = vadd.f32 1e-06, %v2160_v6  ;;  %v2763_v6 = vld [vmem:[%s4534_s22 + $0x38] sm:$0xff] }
 0xe63   : > { %3698 = vrsqrt.f32 %v2161_v7  ;;  %v2762_v7 = vld [vmem:[%s4534_s22 + $0x30] sm:$0xff] }
 0xe70   : > { %v3699_v8 = vpop.eup %3698 }
 0xe71   : > { %v2163_v11 = vmul.f32 %v3699_v8, %v4278_v57  ;;  %v2761_v8 = vld [vmem:[%s4534_s22 + $0x28] sm:$0xff] }
 0xe73   : > { %v2170_v12 = vmul.f32 %v3301_v10, %v2163_v11  ;;  %v2760_v10 = vld [vmem:[%s4534_s22 + $0x20] sm:$0xff]  ;;  %v2759_v11 = vld [vmem:[%s4534_s22 + $0x18] sm:$0xff] }
 0xe75   : > { %3537 = vmatmul.mubr.msk.f32.vlgmr.msra.gmra.mxu1 %vm923_vm0, %v2170_v12  ;;  %v2758_v12 = vld [vmem:[%s4534_s22 + $0x10] sm:$0xff] }
 0xe76   : > { %3551 = vmatpush3.xpose.msk.msra.mxu1 %vm1027_vm2, %v2321_v1  ;;  %3552 = vmatprep.mubr.msk.f32.mxu1 %vm3781_vm1, %v3780_v4 }
 0xe77   : > { %3555 = vmatprep.subr.mxu1 %v3780_v4 }
 0xe92   : > { %v2491_v13 = vpop.permute.xlu0 %2490 }
 0xe93   : > { %3561 = vmatpush3.xpose.msk.msra.mxu0 %vm1027_vm2, %v2491_v13  ;;  %v2757_v13 = vld [vmem:[%s4534_s22 + $0x8] sm:$0xff] }
 0xe94   : > { %3570 = vmatprep.subr.mxu0 %v3780_v4 }
 0xf35   : > { %v2244_v14 = vpop.f32.mrf.mxu1 }
 0xf36   : > { %2488 = vrot.lane.b32.xlu1 %v2244_v14, %s4610_s0  ;;  %3553 = vmatmul.mubr.msk.f32.vlgmr.msra.gmra.mxu1 %vm1027_vm2, %v2244_v14  ;;  %v2756_v14 = vld [vmem:[%s4534_s22] sm:$0xff]  ;;  %s3319_s0 = sshll.u32 %s3956_s3, 7 }
 0xf37   : > { %v3538_v0 = vpop.f32.mrf.mxu1  ;;  %3557 = vmatprep.mubr.msk.f32.mxu1 %vm3781_vm1, %v3780_v4 }
 0xfa8   : > { %v2489_v15 = vpop.permute.xlu1 %2488 }
 0xfa9   : > { %3563 = vmatmul.mubr.msk.f32.vlgmr.msra.gmra.mxu0 %vm1027_vm2, %v2489_v15 }
 0xfaa   : > { %3578 = vmatprep.mubr.msk.f32.mxu0 %vm3781_vm1, %v3780_v4  ;;  %3571 = vmatpush3.msra.mxu0 %v2661_v43  ;;  %v3314_v43 = vld [vmem:[%s4535_s23] ss:$0 sm:$0xff] }
 0xfab   : > { %3572 = vmatprep.subr.mxu0 %v3780_v4 }
 0xfac   : > { %3573 = vmatpush3.msra.mxu0 %v2660_v44 }
 0xfad   : > { %3574 = vmatprep.subr.mxu0 %v3780_v4 }
 0xfae   : > { %3575 = vmatpush3.msra.mxu0 %v2659_v45 }
 0xfaf   : > { %3576 = vmatprep.subr.mxu0 %v3780_v4 }
 0xfb0   : > { %3577 = vmatpush3.msra.mxu0 %v2658_v9  ;;  %v3031_v9 = vand.u32 127, %v1018_v18 }
 0xfb1   : > { %3592 = vmatprep.subr.mxu0 %v3780_v4 }
 0xff6   : > { %v2397_v16 = vpop.f32.mrf.mxu1 }
 0xff7   : > { %v2398_v17 = vadd.f32 %v2397_v16, %v4045_v24 }
 0xff8   : > { %v3554_v19 = vpop.f32.mrf.mxu1 }
 0xff9   : > { %v2401_v20 = vsel %vm1102_vm3, %v2398_v17, -inf }
 0xffa   : > { %2402 = vmax.xlane.f32.xlu1 %v2401_v20 }
0x1069   : > { %v2562_v21 = vpop.f32.mrf.mxu0 }
0x106a   : > { %v2563_v22 = vadd.f32 %v2562_v21, %v4045_v24 }
0x106b   : > { %v3564_v23 = vpop.f32.mrf.mxu0 }
0x106c   : > { %v2566_v25 = vsel %vm1102_vm3, %v2563_v22, -inf }
0x106d   : > { %2567 = vmax.xlane.f32.xlu0 %v2566_v25 }
0x1083   : > { %v2403_v26 = vpop.xlane.xlu1 %2402 }
0x1084   : > { %v2404_v27 = vsub.f32 %v2398_v17, %v2403_v26 }
0x1086   : > { %v2405_v28 = vmul.f32 1.442695, %v2404_v27 }
0x1088   : > { %3700 = vpow2.f32 %v2405_v28 }
0x1095   : > { %v3701_v29 = vpop.eup %3700 }
0x1096   : > { %v2407_v30 = vsel %vm1102_vm3, %v3701_v29, 0.0 }
0x1097   : > { %2408 = vadd.xlane.f32.xlu0 %v2407_v30 }
0x10ad   : > { %2412 = vrot.lane.b32.xlu0 %v2321_v1, %s4609_s8  ;;  %s915_s8 = scalar_lea.vmem %s4540_s28, %s3985_s12 }
0x10f6   : > { %v2568_v31 = vpop.xlane.xlu0 %2567 }
0x10f7   : > { %v2569_v32 = vsub.f32 %v2563_v22, %v2568_v31 }
0x10f9   : > { %v2570_v33 = vmul.f32 1.442695, %v2569_v32 }
0x10fb   : > { %3702 = vpow2.f32 %v2570_v33 }
0x1108   : > { %v3703_v34 = vpop.eup %3702 }
0x1109   : > { %v2572_v24 = vsel %vm1102_vm3, %v3703_v34, 0.0 }
0x110a   : > { %2573 = vadd.xlane.f32.xlu1 %v2572_v24  ;;  %v2943_v24 = vld [vmem:[%s4536_s24 + $0x10] sm:$0xff] }
0x111b   : > { %2577 = vrot.lane.b32.xlu1 %v2321_v1, %s4608_s9  ;;  %v3311_v1 = vld [vmem:[%s4532_s20] ss:$0 sm:$0xff]  ;;  %s3722_s9 = sshll.u32 %s3789_s15, 4  ;;  %s3723_s9 = int_to_ptr.vmem [resolvable:$false] %s3722_s9 }
0x111c   : > { %p3725_p0 = scmp.lt.s32.totalorder %s3106_s13, %s3723_s9 }
0x1120   : > { %v2409_v35 = vpop.xlane.xlu0 %2408 }
0x1121   : > { %3704 = vrcp.f32 %v2409_v35  ;;  %v2942_v35 = vld [vmem:[%s4536_s24 + $0x8] sm:$0xff] }
0x1124   : > { %v2413_v36 = vpop.permute.xlu0 %2412 }
0x1125   : > { %3556 = vmatpush3.msra.mxu1 %v2413_v36  ;;  %v2941_v36 = vld [vmem:[%s4536_s24] sm:$0xff] }
0x1126   : > { %3565 = vmatprep.subr.mxu1 %v3780_v4 }
0x112e   : > { %v3705_v37 = vpop.eup %3704 }
0x112f   : > { %v2411_v38 = vmul.f32 %v3705_v37, %v3701_v29  ;;  %v3788_v37 = vmov 0  }
0x1130   : > { %3670 = vset.pattern.permute.xlu1 %v3788_v37  ;;  %3671 = vset.pattern.permute.xlu0 %v3788_v37 }
0x1131   : > { %3558 = vmatmul.mubr.msk.f32.vlgmr.msra.gmra.mxu1 %vm1102_vm3, %v2411_v38 }
0x1132   : > { %3567 = vmatprep.mubr.msk.f32.mxu1 %vm3781_vm1, %v3780_v4 }
0x1193   : > { %v2574_v39 = vpop.xlane.xlu1 %2573 }
0x1194   : > { %3706 = vrcp.f32 %v2574_v39 }
0x1197   : > { %v2578_v40 = vpop.permute.xlu1 %2577 }
0x1198   : > { %3566 = vmatpush3.msra.mxu1 %v2578_v40 }
0x1199   : > { %3581 = vmatprep.subr.mxu1 %v3780_v4 }
0x11a1   : > { %v3707_v41 = vpop.eup %3706 }
0x11a2   : > { %v2576_v42 = vmul.f32 %v3707_v41, %v3703_v34  ;;  %v2944_v34 = vld [vmem:[%s4536_s24 + $0x18] sm:$0xff] }
0x11a4   : > { %3568 = vmatmul.mubr.msk.f32.vlgmr.msra.gmra.mxu1 %vm1102_vm3, %v2576_v42 }
0x11a5   : > { %3589 = vmatprep.mubr.msk.f32.mxu1 %vm3781_vm1, %v3780_v4  ;;  %3582 = vmatpush3.msra.mxu1 %v2755_v58 }
0x11a6   : > { %3583 = vmatprep.subr.mxu1 %v3780_v4 }
0x11a7   : > { %3584 = vmatpush3.msra.mxu1 %v2754_v59 }
0x11a8   : > { %3585 = vmatprep.subr.mxu1 %v3780_v4 }
0x11f1   : > { %v2484_v46 = vpop.f32.mrf.mxu1 }
0x11f3   : > { %v3559_v47 = vpop.f32.mrf.mxu1 }
0x1264   : > { %v2649_v48 = vpop.f32.mrf.mxu1 }
0x1265   : > { %2654 = vrot.lane.b32.xlu1 %v2649_v48, %s4614_s4  ;;  %s905_s4 = scalar_lea.vmem %s4616_s30, %s3988_s1 }
0x1266   : > { %v3569_v49 = vpop.f32.mrf.mxu1  ;;  %v3019_v38 = vld [vmem:[%s905_s4] sm:$0xff]  ;;  %s3103_s4 = scalar_lea.hbm %s4537_s25, %s3319_s0 }
0x1267   : > { %vm3041_vm7 = vcmp.ne.s32.totalorder %v3019_v38, 4294967196 }
0x1268   : > { %v3317_v58 = vsel %vm3041_vm7, 1.0, %v3780_v4 }
0x1269   : > { %v3056_v59 = vsel %vm3046_vm8, %v3317_v58, 0.0 }
0x12d7   : > { %v2655_v50 = vpop.permute.xlu1 %2654 }
0x12d8   : > { %v2657_v51 = vsel %vm1027_vm2, %v2484_v46, %v2655_v50 }
0x12d9   : > { %3579 = vmatmul.mubr.msk.f32.vlgmr.msra.gmra.mxu0 %vm923_vm0, %v2657_v51 }
0x12da   : > { %3608 = vmatprep.mubr.msk.f32.mxu0 %vm3781_vm1, %v3780_v4  ;;  %3593 = vmatpush3.msra.mxu0 %v2763_v6 }
0x12db   : > { %3594 = vmatprep.subr.mxu0 %v3780_v4 }
0x12dc   : > { %3595 = vmatpush3.msra.mxu0 %v2762_v7 }
0x12dd   : > { %3596 = vmatprep.subr.mxu0 %v3780_v4 }
0x12de   : > { %3597 = vmatpush3.msra.mxu0 %v2761_v8 }
0x12df   : > { %3598 = vmatprep.subr.mxu0 %v3780_v4 }
0x12e0   : > { %3599 = vmatpush3.msra.mxu0 %v2760_v10 }
0x12e1   : > { %3600 = vmatprep.subr.mxu0 %v3780_v4 }
0x12e2   : > { %3601 = vmatpush3.msra.mxu0 %v2759_v11 }
0x12e3   : > { %3602 = vmatprep.subr.mxu0 %v3780_v4 }
0x12e4   : > { %3603 = vmatpush3.msra.mxu0 %v2758_v12 }
0x12e5   : > { %3604 = vmatprep.subr.mxu0 %v3780_v4 }
0x12e6   : > { %3605 = vmatpush3.msra.mxu0 %v2757_v13 }
0x12e7   : > { %3606 = vmatprep.subr.mxu0 %v3780_v4 }
0x12e8   : > { %3607 = vmatpush3.msra.mxu0 %v2756_v14 }
0x1399   : > { %v2731_v52 = vpop.f32.mrf.mxu0 }
0x139a   : > { %v4356_v53 = vadd.f32 %v2731_v52, %v4278_v57  ;;  %v2753_v57 = vld [vmem:[%s4533_s21 + $0x8] sm:$0xff] }
0x139b   : > { %v3580_v54 = vpop.f32.mrf.mxu0  ;;  %3586 = vmatpush3.msra.mxu1 %v2753_v57  ;;  %v3057_v57 = vrot.slane %v3056_v59, 4 }
0x139c   : > { %v2737_v55 = vmul.f32 %v4356_v53, %v4356_v53  ;;  %3587 = vmatprep.subr.mxu1 %v3780_v4 }
0x139d   : > { %3588 = vmatpush3.msra.mxu1 %v2752_v60  ;;  %v3058_v60 = vadd.f32 %v3057_v57, %v3056_v59 }
0x139e   : > { %v2738_v56 = vsel %vm923_vm0, %v2737_v55, 0.0  ;;  %3611 = vmatprep.subr.mxu1 %v3780_v4 }
0x139f   : > { %2739 = vadd.xlane.f32.xlu1 %v2738_v56 }
0x13b0   : > { %3033 = vperm.xlu1 %3670, %v3019_v38  }
0x1428   : > { %v2740_v61 = vpop.xlane.xlu1 %2739 }
0x1429   : > { %v2741_v62 = vmul.f32 0.03125, %v2740_v61  ;;  %v3059_v61 = vrot.slane %v3058_v60, 2 }
0x142b   : > { %v2742_v5 = vadd.f32 1e-06, %v2741_v62  ;;  %v3060_v62 = vadd.f32 %v3059_v61, %v3058_v60 }
0x142c   : > { %v3034_v54 = vpop.permute.xlu1 %3033 }
0x142d   : > { %3708 = vrsqrt.f32 %v2742_v5  ;;  %vm3035_vm6 = vcmp.eq.s32.totalorder %v3031_v9, %v3034_v54  ;;  %v3061_v5 = vrot.slane %v3060_v62, 1 }
0x142e   : > { %v3316_v56 = vsel %vm3035_vm6, 1.0, %v3780_v4 }
0x143a   : > { %v3709_v63 = vpop.eup %3708 }
0x143b   : > { %v2744_v2 = vmul.f32 %v3709_v63, %v4356_v53  ;;  %v3062_v63 = vadd.f32 %v3061_v5, %v3060_v62 }
0x143d   : > { %v2751_v3 = vmul.f32 %v3311_v1, %v2744_v2  ;;  %3063 = vst.msk [vmem:[%s915_s8] sm:$0x1] %vm3054_vm9, %v3062_v63  ;;  %s3724_s8 = scalar_lea.vmem %s3723_s9, 256 }
0x143f   : > { %3590 = vmatmul.mubr.msk.f32.vlgmr.msra.gmra.mxu1 %vm923_vm0, %v2751_v3 }
0x1440   : > { %3619 = vmatprep.mubr.msk.f32.mxu1 %vm3781_vm1, %v3780_v4  ;;  %3612 = vmatpush3.msra.mxu1 %v2944_v34 }
0x1441   : > { %3613 = vmatprep.subr.mxu1 %v3780_v4 }
0x1442   : > { %3614 = vmatpush3.msra.mxu1 %v2943_v24 }
0x1443   : > { %3615 = vmatprep.subr.mxu1 %v3780_v4 }
0x1444   : > { %3616 = vmatpush3.msra.mxu1 %v2942_v35 }
0x1445   : > { %3617 = vmatprep.subr.mxu1 %v3780_v4 }
0x1446   : > { %3618 = vmatpush3.msra.mxu1 %v2941_v36 }
0x14ff   : > { %v2833_v0 = vpop.f32.mrf.mxu1 }
0x1500   : > { %2847 = vrot.lane.b32.xlu0 %v2833_v0, %s4607_s29  ;;  %v2838_v16 = vmul.f32 %v2833_v0, %v2833_v0  ;;  %v2837_v25 = vmul.f32 0.5, %v2833_v0  ;;  %s3718_s29 = scalar_lea.vmem %s3106_s13, 128 }
0x1501   : > { %v3591_v15 = vpop.f32.mrf.mxu1  ;;  %p3719_p11 = scmp.ne.s32.totalorder %s3106_s13, %s3718_s29  ;;  %p3726_p1 = scmp.lt.s32.totalorder %s3724_s8, %s3718_s29 }
0x1502   : > { %v2839_v17 = vmul.f32 %v2838_v16, %v2833_v0 }
0x1503   : > { %p3720_p12 = pnand %p3719_p11, %p3973_p5  ;;  %p3727_p2 = por %p3726_p1, %p3725_p0 }
0x1504   : > { %v2840_v19 = vmul.f32 0.044715, %v2839_v17 }
0x1505   : > { %p3721_p13 = pneg %p3720_p12 }
0x1506   : > { %v2841_v20 = vadd.f32 %v2840_v19, %v2833_v0 }
0x1507   : > { %p3728_p3 = pnand %p3727_p2, %p3721_p13 }
0x1508   : > { %v2842_v21 = vmul.f32 0.7978846, %v2841_v20 }
0x150a   : > { %3710 = vtanh.f32 %v2842_v21 }
0x1517   : > { %v3711_v22 = vpop.eup %3710 }
0x1518   : > { %v2844_v23 = vadd.f32 1.0, %v3711_v22 }
0x151a   : > { %v2845_v26 = vmul.f32 %v2844_v23, %v2837_v25 }
0x1572   : > { %v2848_v27 = vpop.permute.xlu0 %2847 }
0x1573   : > { %v2850_v28 = vmul.f32 %v2848_v27, %v2845_v26 }
0x1575   : > { %3609 = vmatmul.mubr.msk.f32.vlgmr.msra.gmra.mxu0 %vm1556_vm4, %v2850_v28 }
0x1635   : > { %v2920_v29 = vpop.f32.mrf.mxu0 }
0x1636   : > { %v2924_v30 = vadd.f32 %v2920_v29, %v4356_v53 }
0x1637   : > { %v3610_v31 = vpop.f32.mrf.mxu0 }
0x1638   : > { %v2926_v32 = vmul.f32 %v2924_v30, %v2924_v30 }
0x163a   : > { %v2927_v33 = vsel %vm923_vm0, %v2926_v32, 0.0 }
0x163b   : > { %2928 = vadd.xlane.f32.xlu0 %v2927_v33 }
0x16c4   : > { %v2929_v39 = vpop.xlane.xlu0 %2928 }
0x16c5   : > { %v2930_v40 = vmul.f32 0.03125, %v2929_v39 }
0x16c7   : > { %v2931_v41 = vadd.f32 1e-06, %v2930_v40 }
0x16c9   : > { %3712 = vrsqrt.f32 %v2931_v41 }
0x16d6   : > { %v3713_v42 = vpop.eup %3712 }
0x16d7   : > { %v2933_v44 = vmul.f32 %v3713_v42, %v2924_v30 }
0x16d9   : > { %v2940_v45 = vmul.f32 %v3314_v43, %v2933_v44 }
0x16db   : > { %3620 = vmatmul.mubr.msk.f32.vlgmr.msra.gmra.mxu1 %vm923_vm0, %v2940_v45 }
0x179b   : > { %v3014_v46 = vpop.f32.mrf.mxu1 }
0x179c   : > { %3020 = vmax.xlane.f32.xlu0 %v3014_v46  ;;  %3018 = vst [vmem:[%s874_s14] sm:$0xff] %v3014_v46  ;;  %v3038_v18 = vmul.f32 %v3316_v56, %v3014_v46 }
0x179d   : > { %v3621_v47 = vpop.f32.mrf.mxu1 }
0x1825   : > { %v4451_v48 = vpop.xlane.xlu0 %3020 }
0x1826   : > { %v3022_v49 = vsub.f32 %v3014_v46, %v4451_v48  ;;  %vm3064_vm5 = vcmp.eq.f32.partialorder %v3014_v46, %v4451_v48 }
0x1827   : > { %v3065_v50 = vsel %vm3064_vm5, %v3031_v9, 128 }
0x1828   : > { %v3023_v51 = vmul.f32 1.442695, %v3022_v49  ;;  %v3067_v52 = vshra.s32 %v3065_v50, 16  ;;  %v3066_v4 = vand.u32 65535, %v3065_v50 }
0x182a   : > { %3714 = vpow2.f32 %v3023_v51  ;;  %v3069_v53 = vcvt.s32.f32 %v3067_v52  ;;  %v3068_v2 = vcvt.s32.f32 %v3066_v4 }
0x182c   : > { %3070 = vmin.xlane.f32.xlu0 %v3069_v53 }
0x1837   : > { %v3715_v55 = vpop.eup %3714 }
0x1838   : > { %3025 = vadd.xlane.f32.xlu0 %v3715_v55 }
0x183c   : > { %3039 = vadd.xlane.f32.xlu0 %v3038_v18 }
0x18b5   : > { %v3071_v1 = vpop.xlane.xlu0 %3070 }
0x18b6   : > { %vm3072_vm10 = vcmp.eq.f32.partialorder %v3069_v53, %v3071_v1 }
0x18b7   : > { %v3073_v3 = vsel %vm3072_vm10, %v3068_v2, inf }
0x18b8   : > { %3074 = vmin.xlane.f32.xlu0 %v3073_v3 }
0x18c1   : > { %v3026_v6 = vpop.xlane.xlu0 %3025 }
0x18c2   : > { %3716 = vlog2.f32 %v3026_v6 }
0x18c3   : > { %3731 = shalt.err (!%p3728_p3)
}
0x18c4   : > { %s3732_s3 = scalar_lea.hbm %s3103_s4, 128  ;;  %s3736_s14 = scalar_lea.hbm %s4537_s25, 256 }
0x18c5   : > { %p3733_p4 = scmp.ne.s32.totalorder %s3103_s4, %s3732_s3  ;;  %p3737_p9 = scmp.lt.s32.totalorder %s3103_s4, %s4537_s25 }
0x18c6   : > { %p3738_p10 = scmp.lt.s32.totalorder %s3736_s14, %s3732_s3 }
0x18c7   : > { %p3734_p7 = pnand %p3733_p4, %p3973_p5 }
0x18c8   : > { %p3739_p11 = por %p3738_p10, %p3737_p9 }
0x18c9   : > { %p3735_p8 = pneg %p3734_p7 }
0x18cb   : > { %p3740_p12 = pnand %p3739_p11, %p3735_p8 }
0x18cd   : > { %3743 = shalt.err (!%p3740_p12)
}
0x18ce   : > { %3622 = dma.vmem_to_hbm [thread:$0]  (%p3973_p5), %s3106_s13, 128, %s3103_s4, %s3082_s6   ;;  %v3040_v11 = vpop.xlane.xlu0 %3039  ;;  %v3077_v21 = vcvt.f32.s32 %v3071_v1 }
0x18cf   : > { %v3717_v7 = vpop.eup %3716  ;;  %s912_s2 = scalar_lea.vmem %s4539_s27, %s3985_s12  ;;  %s909_s6 = scalar_lea.vmem %s4538_s26, %s3988_s1 }
0x18d0   : > { %v3028_v8 = vmul.f32 0.6931472, %v3717_v7  ;;  %v3078_v23 = vshll.u32 %v3077_v21, 16 }
0x18d2   : > { %v3029_v10 = vadd.f32 %v3028_v8, %v4451_v48 }
0x18d4   : > { %v3044_v12 = vsub.f32 %v3029_v10, %v3040_v11 }
0x18d6   : > { %v3045_v13 = vmul.f32 %v3317_v58, %v3044_v12 }
0x18d8   : > { %v3047_v14 = vsel %vm3046_vm8, %v3045_v13, 0.0 }
0x18d9   : > { %v3048_v0 = vrot.slane %v3047_v14, 4 }
0x18db   : > { %v3049_v15 = vadd.f32 %v3048_v0, %v3047_v14 }
0x18dd   : > { %v3050_v16 = vrot.slane %v3049_v15, 2 }
0x18df   : > { %v3051_v17 = vadd.f32 %v3050_v16, %v3049_v15 }
0x18e1   : > { %v3052_v19 = vrot.slane %v3051_v17, 1 }
0x18e3   : > { %v3053_v20 = vadd.f32 %v3052_v19, %v3051_v17 }
0x18e5   : > { %3055 = vst.msk [vmem:[%s912_s2] sm:$0x1] %vm3054_vm9, %v3053_v20 }
0x1941   : > { %v3075_v22 = vpop.xlane.xlu0 %3074 }
0x1942   : > { %v3076_v25 = vcvt.f32.s32 %v3075_v22 }
0x1944   : > { %v3079_v26 = vadd.s32 %v3078_v23, %v3076_v25 }
0x1946   : > { %3080 = vst.msk [vmem:[%s909_s6] sm:$0xff] %vm3046_vm8, %v3079_v26 }
0x1947 PF: > { %s4617_s15 = sld [smem:[#allocation7_spill]] }
0x1948   : > { %s4618_s9 = sld [smem:[#allocation5_spill]] }
0x194d   : > { %p3628_p5 = scmp.ge.s32.totalorder %s4617_s15, 2 }
0x194e   : > { %s3126_s12 = sand.u32 1, %s4618_s9  }
0x194f   : > { %p3625_p13 = pnand %p3628_p5, %p3977_p6  ;;  %s3127_s3 = scalar_lea.sflag [#allocation3], %s3126_s12 }
0x1951   : > { %p3626_p0 = pneg %p3625_p13 }
0x1953   : > { %3761 = dma.done.wait (%p3626_p0), %s3127_s3, 128  }
0x1954   : > { %3763 = vsyncadd (%p3626_p0), %s3127_s3, 4294967168  ;;  %s4620_s30 = sld [smem:[#allocation8_spill]]  ;;  %s4623_s8 = smov %s3770_s5 }
0x1955   : > { %s4621_s10 = sld [smem:[#allocation6_spill]] }
0x1956   : > { %s4622_s9 = sld [smem:[#allocation9_spill]] }
0x195a   : > { %p39_p1 = scmp.ge.s32.totalorder %s4620_s30, 4  }
0x195b   : > { %s4624_s5 = smov %s4621_s10 }
0x195c   :  { %41 = sbr.rel (!%p39_p1) target bundleno = 20 (0x14), region = 202 }
0x1961   :  { %3151 = vsyncpa [#allocation3], 1 }
0x1962   :  { %3153 = vsyncpa [#allocation3 + $0x1], 1 }

</bundles_post_ra>
